<compile_context>
chip_gen: v6e
topology: v6e:2x2x1
jax: 0.10.0
libtpu: 0.0.40
codegen_flags: <defaults>
</compile_context>

<pallas_src>
import numpy as np
import jax
import jax.numpy as jnp
from jax import lax
from jax.experimental import pallas as pl
from jax.experimental.pallas import tpu as pltpu

# ----- model dimensions (small, consistent with the module defaults) -----
B, S = 2, 8            # batch, sequence length
E = 64                 # embedding_dim (EMBEDDING_DIM stand-in)
H = 128                # hidden_dim
NUM_ASPECTS = 10
POLARITIES = 3
OUT = NUM_ASPECTS * POLARITIES   # 30
OUT_PAD = 128                    # lane-dense padded output width
VOCAB = 50

MXU_DTYPE = jnp.bfloat16         # MXU operand dtype (f32 accumulation kept)


# --------------------------- fused Pallas kernel ---------------------------

def atae_fused_kernel(idx_ref, tbl_ref, whh_ref, v_ref, wd_ref, bd_ref,
                      out_ref, xg_sc):
    """Fused embedding-gather + LSTM + bi_linear NoQueryAttention + dense.

    idx_ref: (S*B,)       int32 SMEM  time-major token indices (row t*B + b)
    tbl_ref: (VOCAB, 4H)  f32   VMEM  emb @ Wih^T + (bih+bhh), gate order (i,f,o,g)
    whh_ref: (H, 4H)      bf16  VMEM  Whh^T, gate order (i,f,o,g)
    v_ref:   (1, H)       f32   VMEM  precomputed bilinear scoring vector
    wd_ref:  (H, OUT_PAD) bf16  VMEM  dense W^T, zero-padded to 128 lanes
    bd_ref:  (1, OUT_PAD) f32
    out_ref: (B, OUT_PAD) f32
    xg_sc:   (S*B, 4H)    f32   VMEM scratch for gathered gate rows
    """
    # 1) fused embedding / input-projection gather: SMEM scalar index drives a
    #    dynamic row slice of the precomputed gate table (no MXU op needed).
    for r in range(S * B):
        xg_sc[pl.ds(r, 1), :] = tbl_ref[pl.ds(idx_ref[r], 1), :]

    # 2) LSTM recurrence, fully unrolled (static trip count S).
    v = v_ref[...]                                    # (1, H)
    h = jnp.zeros((B, H), jnp.float32)
    c = jnp.zeros((B, H), jnp.float32)
    hs = []                                           # each h_t: one vreg
    logit_cols = []
    for t in range(S):
        gates = xg_sc[pl.ds(t * B, B), :] + jnp.dot(
            h.astype(MXU_DTYPE), whh_ref[...],
            preferred_element_type=jnp.float32)       # (B, 4H), order (i,f,o,g)
        sig = jax.nn.sigmoid(gates[:, :3 * H])        # single EUP slab for i,f,o
        i_g = sig[:, 0 * H:1 * H]
        f_g = sig[:, 1 * H:2 * H]
        o_g = sig[:, 2 * H:3 * H]
        g_g = jnp.tanh(gates[:, 3 * H:])
        c = f_g * c + i_g * g_g
        h = o_g * jnp.tanh(c)
        hs.append(h)
        logit_cols.append(jnp.sum(h * v, axis=-1, keepdims=True))    # (B, 1)

    # 3) softmax over time (lane axis) + context; no hidden-state writeback.
    #    bk's contribution is a constant logit shift, dropped at param prep.
    logits = jnp.concatenate(logit_cols, axis=1)      # (B, S)
    m = jnp.max(logits, axis=-1, keepdims=True)
    e = jnp.exp(logits - m)
    denom = jnp.sum(e, axis=-1, keepdims=True)
    wgt = e * pl.reciprocal(denom, approx=True)       # (B, S)
    ctx = wgt[:, 0:1] * hs[0]
    for t in range(1, S):
        ctx = ctx + wgt[:, t:t + 1] * hs[t]           # (B, H)

    # 4) final dense: single (B,H)@(H,128) matmul, lane-dense unmasked store.
    out_ref[...] = (jnp.dot(ctx.astype(MXU_DTYPE), wd_ref[...],
                            preferred_element_type=jnp.float32)
                    + bd_ref[...])                    # (B, OUT_PAD)


# ------------------------------ wrappers -----------------------------------

def atae_fused_pallas(idx_flat, pp):
    return pl.pallas_call(
        atae_fused_kernel,
        out_shape=jax.ShapeDtypeStruct((B, OUT_PAD), jnp.float32),
        in_specs=[
            pl.BlockSpec(memory_space=pltpu.MemorySpace.SMEM),   # idx
            pl.BlockSpec(memory_space=pltpu.MemorySpace.VMEM),   # gate_tbl
            pl.BlockSpec(memory_space=pltpu.MemorySpace.VMEM),   # Whh_T
            pl.BlockSpec(memory_space=pltpu.MemorySpace.VMEM),   # v
            pl.BlockSpec(memory_space=pltpu.MemorySpace.VMEM),   # Wd_T
            pl.BlockSpec(memory_space=pltpu.MemorySpace.VMEM),   # bd
        ],
        out_specs=pl.BlockSpec(memory_space=pltpu.MemorySpace.VMEM),
        scratch_shapes=[pltpu.VMEM((S * B, 4 * H), jnp.float32)],
    )(idx_flat, pp["gate_tbl"], pp["Whh_T"], pp["v"], pp["Wd_T"], pp["bd"])


def prepare_params(p):
    """One-time parameter prep: gate-column permutation to (i,f,o,g), embedding
    + input-projection folding into a (VOCAB, 4H) gate table, bilinear scoring
    vector collapse, lane-dense dense-layer padding, bf16 casts for MXU."""
    # PyTorch gate order (i, f, g, o) -> kernel order (i, f, o, g)
    perm = jnp.concatenate([jnp.arange(0, H), jnp.arange(H, 2 * H),
                            jnp.arange(3 * H, 4 * H), jnp.arange(2 * H, 3 * H)])
    Wih_p = p["Wih"][perm]                              # (4H, E)
    Whh_p = p["Whh"][perm]                              # (4H, H)
    b_p = (p["bih"] + p["bhh"])[perm]                   # (4H,)

    # Fold embedding + input projection: gather of this table == x@Wih^T + b.
    gate_tbl = p["emb"] @ Wih_p.T + b_p                 # (VOCAB, 4H), f32 exact

    # Collapse the bilinear score to a single vector (bk dropped: const shift).
    qx = p["q"] @ p["Wq"].T + p["bq"]                   # (1, H)
    qw = qx @ p["Wbl"]                                  # (1, H)
    v = qw @ p["Wk"]                                    # (1, H)

    # Lane-dense dense layer: pad OUT=30 -> 128 output lanes.
    Wd_T = jnp.zeros((H, OUT_PAD), jnp.float32).at[:, :OUT].set(p["Wd"].T)
    bd = jnp.zeros((1, OUT_PAD), jnp.float32).at[0, :OUT].set(p["bd"])

    return {
        "gate_tbl": gate_tbl.astype(jnp.float32),       # (VOCAB, 4H)
        "Whh_T":    Whh_p.T.astype(MXU_DTYPE),          # (H, 4H)
        "v":        v.astype(jnp.float32),              # (1, H)
        "Wd_T":     Wd_T.astype(MXU_DTYPE),             # (H, OUT_PAD)
        "bd":       bd,                                 # (1, OUT_PAD)
    }


@jax.jit
def atae_lstm_forward(text_indices, pp):
    # Only glue left outside the kernel: flatten indices to time-major order
    # (row t*B + b == text_indices[b, t]) — the gather itself is in-kernel.
    idx_tm = jnp.reshape(jnp.transpose(text_indices), (-1,)).astype(jnp.int32)
    out = atae_fused_pallas(idx_tm, pp)                 # (B, OUT_PAD)
    return out[:, :OUT].reshape(B, NUM_ASPECTS, POLARITIES)
    # TODO(synk): for real throughput, batch many examples per call (B multiple
    # of 8+) and add a parallel batch grid axis so v7x's second TC is used.


# --------------------------- pure-JAX f32 reference -------------------------

def reference_forward(text_indices, p):
    x = jnp.take(p["emb"], text_indices, axis=0)        # (B, S, E)

    def cell(carry, x_t):
        h, c = carry
        gates = x_t @ p["Wih"].T + h @ p["Whh"].T + p["bih"] + p["bhh"]
        i = jax.nn.sigmoid(gates[:, :H])
        f = jax.nn.sigmoid(gates[:, H:2 * H])
        g = jnp.tanh(gates[:, 2 * H:3 * H])
        o = jax.nn.sigmoid(gates[:, 3 * H:])
        c = f * c + i * g
        h = o * jnp.tanh(c)
        return (h, c), h

    init = (jnp.zeros((B, H), jnp.float32), jnp.zeros((B, H), jnp.float32))
    _, h_seq = lax.scan(cell, init, jnp.transpose(x, (1, 0, 2)))
    h = jnp.transpose(h_seq, (1, 0, 2))                  # (B, S, H)

    kx = h @ p["Wk"].T + p["bk"]                         # (B, S, H)
    qx = p["q"] @ p["Wq"].T + p["bq"]                    # (1, H)
    qw = qx @ p["Wbl"]                                   # (1, H)
    logits = jnp.einsum("bsh,h->bs", kx, qw[0])
    score = jax.nn.softmax(logits, axis=-1)              # (B, S)
    ctx = jnp.einsum("bs,bsh->bh", score, h)             # (B, H)
    out = ctx @ p["Wd"].T + p["bd"]                      # (B, OUT)
    return out.reshape(B, NUM_ASPECTS, POLARITIES)


# --------------------------------- main -------------------------------------

if __name__ == "__main__":
    key = jax.random.PRNGKey(0)
    keys = jax.random.split(key, 16)

    def uni(k, shape, scale):
        return jax.random.uniform(k, shape, jnp.float32, -scale, scale)

    s_h = 1.0 / float(np.sqrt(H))
    params = {
        "emb": uni(keys[0], (VOCAB, E), 1.0),       # synthetic embedding matrix
        "Wih": uni(keys[1], (4 * H, E), s_h),
        "Whh": uni(keys[2], (4 * H, H), s_h),
        "bih": uni(keys[3], (4 * H,), s_h),
        "bhh": uni(keys[4], (4 * H,), s_h),
        "Wk":  uni(keys[5], (H, H), s_h),
        "bk":  uni(keys[6], (H,), s_h),
        "Wq":  uni(keys[7], (H, H), s_h),
        "bq":  uni(keys[8], (H,), s_h),
        "Wbl": uni(keys[9], (H, H), s_h),            # bi_linear attention weight
        "q":   uni(keys[10], (1, H), s_h),           # NoQueryAttention query
        "Wd":  uni(keys[11], (OUT, H), s_h),
        "bd":  uni(keys[12], (OUT,), s_h),
    }
    # NOTE: attention's self.proj / dropout are not used by ATAE_LSTM.forward
    # (only `score` is consumed), so they are intentionally omitted.

    text_indices = jax.random.randint(keys[13], (B, S), 0, VOCAB,
                                      dtype=jnp.int32)

    prepared = prepare_params(params)                # one-time parameter prep

    out = atae_lstm_forward(text_indices, prepared)
    out = jax.block_until_ready(out)
    assert out.shape == (B, NUM_ASPECTS, POLARITIES)

    ref = jax.block_until_ready(reference_forward(text_indices, params))
    # bf16 MXU operands (f32 accumulation) in the recurrence / dense vs. the
    # pure-f32 reference -> modest tolerance.
    np.testing.assert_allclose(np.asarray(out), np.asarray(ref),
                               rtol=2e-2, atol=2e-2)

    print("KERNEL_OK")
</pallas_src>

<mosaic_0001>
module attributes {stable_mosaic.version = 11 : i64} {
  func.func @atae_fused_kernel(%arg0: memref<16xi32, #tpu.memory_space<smem>>, %arg1: memref<50x512xf32, #tpu.memory_space<vmem>>, %arg2: memref<128x512xbf16, #tpu.memory_space<vmem>>, %arg3: memref<1x128xf32, #tpu.memory_space<vmem>>, %arg4: memref<128x128xbf16, #tpu.memory_space<vmem>>, %arg5: memref<1x128xf32, #tpu.memory_space<vmem>>, %arg6: memref<2x128xf32, #tpu.memory_space<vmem>>, %arg7: memref<16x512xf32, #tpu.memory_space<vmem>>) attributes {dimension_semantics = [], scalar_prefetch = 0 : i64, scratch_operands = 1 : i64, tpu.core_type = #tpu.core_type<tc>} {
    %c0 = arith.constant 0 : index
    %0 = memref.load %arg0[%c0] : memref<16xi32, #tpu.memory_space<smem>>
    %1 = arith.index_cast %0 : i32 to index
    %c0_0 = arith.constant 0 : index
    %2 = vector.load %arg1[%1, %c0_0] : memref<50x512xf32, #tpu.memory_space<vmem>>, vector<1x512xf32>
    %c0_1 = arith.constant 0 : index
    %c0_2 = arith.constant 0 : index
    %3 = vector.load %arg7[%c0_1, %c0_2] : memref<16x512xf32, #tpu.memory_space<vmem>>, vector<1x512xf32>
    tpu.vector_store %arg7[%c0_1, %c0_2], %2 {strides = array<i32>} : memref<16x512xf32, #tpu.memory_space<vmem>>, vector<1x512xf32>,
    %c1 = arith.constant 1 : index
    %4 = memref.load %arg0[%c1] : memref<16xi32, #tpu.memory_space<smem>>
    %5 = arith.index_cast %4 : i32 to index
    %c0_3 = arith.constant 0 : index
    %6 = vector.load %arg1[%5, %c0_3] : memref<50x512xf32, #tpu.memory_space<vmem>>, vector<1x512xf32>
    %c1_4 = arith.constant 1 : index
    %c0_5 = arith.constant 0 : index
    %7 = vector.load %arg7[%c1_4, %c0_5] : memref<16x512xf32, #tpu.memory_space<vmem>>, vector<1x512xf32>
    tpu.vector_store %arg7[%c1_4, %c0_5], %6 {strides = array<i32>} : memref<16x512xf32, #tpu.memory_space<vmem>>, vector<1x512xf32>,
    %c2 = arith.constant 2 : index
    %8 = memref.load %arg0[%c2] : memref<16xi32, #tpu.memory_space<smem>>
    %9 = arith.index_cast %8 : i32 to index
    %c0_6 = arith.constant 0 : index
    %10 = vector.load %arg1[%9, %c0_6] : memref<50x512xf32, #tpu.memory_space<vmem>>, vector<1x512xf32>
    %c2_7 = arith.constant 2 : index
    %c0_8 = arith.constant 0 : index
    %11 = vector.load %arg7[%c2_7, %c0_8] : memref<16x512xf32, #tpu.memory_space<vmem>>, vector<1x512xf32>
    tpu.vector_store %arg7[%c2_7, %c0_8], %10 {strides = array<i32>} : memref<16x512xf32, #tpu.memory_space<vmem>>, vector<1x512xf32>,
    %c3 = arith.constant 3 : index
    %12 = memref.load %arg0[%c3] : memref<16xi32, #tpu.memory_space<smem>>
    %13 = arith.index_cast %12 : i32 to index
    %c0_9 = arith.constant 0 : index
    %14 = vector.load %arg1[%13, %c0_9] : memref<50x512xf32, #tpu.memory_space<vmem>>, vector<1x512xf32>
    %c3_10 = arith.constant 3 : index
    %c0_11 = arith.constant 0 : index
    %15 = vector.load %arg7[%c3_10, %c0_11] : memref<16x512xf32, #tpu.memory_space<vmem>>, vector<1x512xf32>
    tpu.vector_store %arg7[%c3_10, %c0_11], %14 {strides = array<i32>} : memref<16x512xf32, #tpu.memory_space<vmem>>, vector<1x512xf32>,
    %c4 = arith.constant 4 : index
    %16 = memref.load %arg0[%c4] : memref<16xi32, #tpu.memory_space<smem>>
    %17 = arith.index_cast %16 : i32 to index
    %c0_12 = arith.constant 0 : index
    %18 = vector.load %arg1[%17, %c0_12] : memref<50x512xf32, #tpu.memory_space<vmem>>, vector<1x512xf32>
    %c4_13 = arith.constant 4 : index
    %c0_14 = arith.constant 0 : index
    %19 = vector.load %arg7[%c4_13, %c0_14] : memref<16x512xf32, #tpu.memory_space<vmem>>, vector<1x512xf32>
    tpu.vector_store %arg7[%c4_13, %c0_14], %18 {strides = array<i32>} : memref<16x512xf32, #tpu.memory_space<vmem>>, vector<1x512xf32>,
    %c5 = arith.constant 5 : index
    %20 = memref.load %arg0[%c5] : memref<16xi32, #tpu.memory_space<smem>>
    %21 = arith.index_cast %20 : i32 to index
    %c0_15 = arith.constant 0 : index
    %22 = vector.load %arg1[%21, %c0_15] : memref<50x512xf32, #tpu.memory_space<vmem>>, vector<1x512xf32>
    %c5_16 = arith.constant 5 : index
    %c0_17 = arith.constant 0 : index
    %23 = vector.load %arg7[%c5_16, %c0_17] : memref<16x512xf32, #tpu.memory_space<vmem>>, vector<1x512xf32>
    tpu.vector_store %arg7[%c5_16, %c0_17], %22 {strides = array<i32>} : memref<16x512xf32, #tpu.memory_space<vmem>>, vector<1x512xf32>,
    %c6 = arith.constant 6 : index
    %24 = memref.load %arg0[%c6] : memref<16xi32, #tpu.memory_space<smem>>
    %25 = arith.index_cast %24 : i32 to index
    %c0_18 = arith.constant 0 : index
    %26 = vector.load %arg1[%25, %c0_18] : memref<50x512xf32, #tpu.memory_space<vmem>>, vector<1x512xf32>
    %c6_19 = arith.constant 6 : index
    %c0_20 = arith.constant 0 : index
    %27 = vector.load %arg7[%c6_19, %c0_20] : memref<16x512xf32, #tpu.memory_space<vmem>>, vector<1x512xf32>
    tpu.vector_store %arg7[%c6_19, %c0_20], %26 {strides = array<i32>} : memref<16x512xf32, #tpu.memory_space<vmem>>, vector<1x512xf32>,
    %c7 = arith.constant 7 : index
    %28 = memref.load %arg0[%c7] : memref<16xi32, #tpu.memory_space<smem>>
    %29 = arith.index_cast %28 : i32 to index
    %c0_21 = arith.constant 0 : index
    %30 = vector.load %arg1[%29, %c0_21] : memref<50x512xf32, #tpu.memory_space<vmem>>, vector<1x512xf32>
    %c7_22 = arith.constant 7 : index
    %c0_23 = arith.constant 0 : index
    %31 = vector.load %arg7[%c7_22, %c0_23] : memref<16x512xf32, #tpu.memory_space<vmem>>, vector<1x512xf32>
    tpu.vector_store %arg7[%c7_22, %c0_23], %30 {strides = array<i32>} : memref<16x512xf32, #tpu.memory_space<vmem>>, vector<1x512xf32>,
    %c8 = arith.constant 8 : index
    %32 = memref.load %arg0[%c8] : memref<16xi32, #tpu.memory_space<smem>>
    %33 = arith.index_cast %32 : i32 to index
    %c0_24 = arith.constant 0 : index
    %34 = vector.load %arg1[%33, %c0_24] : memref<50x512xf32, #tpu.memory_space<vmem>>, vector<1x512xf32>
    %c8_25 = arith.constant 8 : index
    %c0_26 = arith.constant 0 : index
    %35 = vector.load %arg7[%c8_25, %c0_26] : memref<16x512xf32, #tpu.memory_space<vmem>>, vector<1x512xf32>
    tpu.vector_store %arg7[%c8_25, %c0_26], %34 {strides = array<i32>} : memref<16x512xf32, #tpu.memory_space<vmem>>, vector<1x512xf32>,
    %c9 = arith.constant 9 : index
    %36 = memref.load %arg0[%c9] : memref<16xi32, #tpu.memory_space<smem>>
    %37 = arith.index_cast %36 : i32 to index
    %c0_27 = arith.constant 0 : index
    %38 = vector.load %arg1[%37, %c0_27] : memref<50x512xf32, #tpu.memory_space<vmem>>, vector<1x512xf32>
    %c9_28 = arith.constant 9 : index
    %c0_29 = arith.constant 0 : index
    %39 = vector.load %arg7[%c9_28, %c0_29] : memref<16x512xf32, #tpu.memory_space<vmem>>, vector<1x512xf32>
    tpu.vector_store %arg7[%c9_28, %c0_29], %38 {strides = array<i32>} : memref<16x512xf32, #tpu.memory_space<vmem>>, vector<1x512xf32>,
    %c10 = arith.constant 10 : index
    %40 = memref.load %arg0[%c10] : memref<16xi32, #tpu.memory_space<smem>>
    %41 = arith.index_cast %40 : i32 to index
    %c0_30 = arith.constant 0 : index
    %42 = vector.load %arg1[%41, %c0_30] : memref<50x512xf32, #tpu.memory_space<vmem>>, vector<1x512xf32>
    %c10_31 = arith.constant 10 : index
    %c0_32 = arith.constant 0 : index
    %43 = vector.load %arg7[%c10_31, %c0_32] : memref<16x512xf32, #tpu.memory_space<vmem>>, vector<1x512xf32>
    tpu.vector_store %arg7[%c10_31, %c0_32], %42 {strides = array<i32>} : memref<16x512xf32, #tpu.memory_space<vmem>>, vector<1x512xf32>,
    %c11 = arith.constant 11 : index
    %44 = memref.load %arg0[%c11] : memref<16xi32, #tpu.memory_space<smem>>
    %45 = arith.index_cast %44 : i32 to index
    %c0_33 = arith.constant 0 : index
    %46 = vector.load %arg1[%45, %c0_33] : memref<50x512xf32, #tpu.memory_space<vmem>>, vector<1x512xf32>
    %c11_34 = arith.constant 11 : index
    %c0_35 = arith.constant 0 : index
    %47 = vector.load %arg7[%c11_34, %c0_35] : memref<16x512xf32, #tpu.memory_space<vmem>>, vector<1x512xf32>
    tpu.vector_store %arg7[%c11_34, %c0_35], %46 {strides = array<i32>} : memref<16x512xf32, #tpu.memory_space<vmem>>, vector<1x512xf32>,
    %c12 = arith.constant 12 : index
    %48 = memref.load %arg0[%c12] : memref<16xi32, #tpu.memory_space<smem>>
    %49 = arith.index_cast %48 : i32 to index
    %c0_36 = arith.constant 0 : index
    %50 = vector.load %arg1[%49, %c0_36] : memref<50x512xf32, #tpu.memory_space<vmem>>, vector<1x512xf32>
    %c12_37 = arith.constant 12 : index
    %c0_38 = arith.constant 0 : index
    %51 = vector.load %arg7[%c12_37, %c0_38] : memref<16x512xf32, #tpu.memory_space<vmem>>, vector<1x512xf32>
    tpu.vector_store %arg7[%c12_37, %c0_38], %50 {strides = array<i32>} : memref<16x512xf32, #tpu.memory_space<vmem>>, vector<1x512xf32>,
    %c13 = arith.constant 13 : index
    %52 = memref.load %arg0[%c13] : memref<16xi32, #tpu.memory_space<smem>>
    %53 = arith.index_cast %52 : i32 to index
    %c0_39 = arith.constant 0 : index
    %54 = vector.load %arg1[%53, %c0_39] : memref<50x512xf32, #tpu.memory_space<vmem>>, vector<1x512xf32>
    %c13_40 = arith.constant 13 : index
    %c0_41 = arith.constant 0 : index
    %55 = vector.load %arg7[%c13_40, %c0_41] : memref<16x512xf32, #tpu.memory_space<vmem>>, vector<1x512xf32>
    tpu.vector_store %arg7[%c13_40, %c0_41], %54 {strides = array<i32>} : memref<16x512xf32, #tpu.memory_space<vmem>>, vector<1x512xf32>,
    %c14 = arith.constant 14 : index
    %56 = memref.load %arg0[%c14] : memref<16xi32, #tpu.memory_space<smem>>
    %57 = arith.index_cast %56 : i32 to index
    %c0_42 = arith.constant 0 : index
    %58 = vector.load %arg1[%57, %c0_42] : memref<50x512xf32, #tpu.memory_space<vmem>>, vector<1x512xf32>
    %c14_43 = arith.constant 14 : index
    %c0_44 = arith.constant 0 : index
    %59 = vector.load %arg7[%c14_43, %c0_44] : memref<16x512xf32, #tpu.memory_space<vmem>>, vector<1x512xf32>
    tpu.vector_store %arg7[%c14_43, %c0_44], %58 {strides = array<i32>} : memref<16x512xf32, #tpu.memory_space<vmem>>, vector<1x512xf32>,
    %c15 = arith.constant 15 : index
    %60 = memref.load %arg0[%c15] : memref<16xi32, #tpu.memory_space<smem>>
    %61 = arith.index_cast %60 : i32 to index
    %c0_45 = arith.constant 0 : index
    %62 = vector.load %arg1[%61, %c0_45] : memref<50x512xf32, #tpu.memory_space<vmem>>, vector<1x512xf32>
    %c15_46 = arith.constant 15 : index
    %c0_47 = arith.constant 0 : index
    %63 = vector.load %arg7[%c15_46, %c0_47] : memref<16x512xf32, #tpu.memory_space<vmem>>, vector<1x512xf32>
    tpu.vector_store %arg7[%c15_46, %c0_47], %62 {strides = array<i32>} : memref<16x512xf32, #tpu.memory_space<vmem>>, vector<1x512xf32>,
    %c0_48 = arith.constant 0 : index
    %c0_49 = arith.constant 0 : index
    %64 = vector.load %arg3[%c0_48, %c0_49] : memref<1x128xf32, #tpu.memory_space<vmem>>, vector<1x128xf32>
    %cst = arith.constant 0.000000e+00 : f32
    %65 = vector.broadcast %cst : f32 to vector<2x128xf32>
    %cst_50 = arith.constant 0.000000e+00 : f32
    %66 = vector.broadcast %cst_50 : f32 to vector<2x128xf32>
    %c0_51 = arith.constant 0 : index
    %c0_52 = arith.constant 0 : index
    %67 = vector.load %arg7[%c0_51, %c0_52] : memref<16x512xf32, #tpu.memory_space<vmem>>, vector<2x512xf32>
    %68 = arith.truncf %65 : vector<2x128xf32> to vector<2x128xbf16>
    %c0_53 = arith.constant 0 : index
    %c0_54 = arith.constant 0 : index
    %69 = vector.load %arg2[%c0_53, %c0_54] : memref<128x512xbf16, #tpu.memory_space<vmem>>, vector<128x512xbf16>
    %cst_55 = arith.constant dense<0.000000e+00> : vector<2x512xf32>
    %70 = tpu.matmul %68, %69, %cst_55 {dimension_numbers = #tpu.dot_dimension_numbers<[1], [0], [0], [1], [0, 0, 1, 1], [], []>} : vector<2x128xbf16>, vector<128x512xbf16>, vector<2x512xf32> -> vector<2x512xf32>
    %71 = arith.addf %67, %70 : vector<2x512xf32>
    %72 = vector.extract_strided_slice %71 {offsets = [0, 0], sizes = [2, 384], strides = [1, 1]} : vector<2x512xf32> to vector<2x384xf32>
    %73 = arith.negf %72 : vector<2x384xf32>
    %74 = math.exp %73 : vector<2x384xf32>
    %cst_56 = arith.constant 1.000000e+00 : f32
    %75 = vector.broadcast %cst_56 : f32 to vector<2x384xf32>
    %76 = arith.addf %75, %74 : vector<2x384xf32>
    %77 = arith.divf %75, %76 : vector<2x384xf32>
    %78 = vector.extract_strided_slice %77 {offsets = [0, 0], sizes = [2, 128], strides = [1, 1]} : vector<2x384xf32> to vector<2x128xf32>
    %79 = vector.extract_strided_slice %77 {offsets = [0, 128], sizes = [2, 128], strides = [1, 1]} : vector<2x384xf32> to vector<2x128xf32>
    %80 = vector.extract_strided_slice %77 {offsets = [0, 256], sizes = [2, 128], strides = [1, 1]} : vector<2x384xf32> to vector<2x128xf32>
    %81 = vector.extract_strided_slice %71 {offsets = [0, 384], sizes = [2, 128], strides = [1, 1]} : vector<2x512xf32> to vector<2x128xf32>
    %82 = math.tanh %81 : vector<2x128xf32>
    %83 = arith.mulf %79, %66 : vector<2x128xf32>
    %84 = arith.mulf %78, %82 : vector<2x128xf32>
    %85 = arith.addf %83, %84 : vector<2x128xf32>
    %86 = math.tanh %85 : vector<2x128xf32>
    %87 = arith.mulf %80, %86 : vector<2x128xf32>
    %88 = vector.broadcast %64 : vector<1x128xf32> to vector<2x128xf32>
    %89 = arith.mulf %87, %88 : vector<2x128xf32>
    %cst_57 = arith.constant dense<0.000000e+00> : vector<2xf32>
    %90 = vector.multi_reduction <add>, %89, %cst_57 [1] : vector<2x128xf32> to vector<2xf32>
    %91 = vector.shape_cast %90 : vector<2xf32> to vector<2x1xf32>
    %c2_58 = arith.constant 2 : index
    %c0_59 = arith.constant 0 : index
    %92 = vector.load %arg7[%c2_58, %c0_59] : memref<16x512xf32, #tpu.memory_space<vmem>>, vector<2x512xf32>
    %93 = arith.truncf %87 : vector<2x128xf32> to vector<2x128xbf16>
    %c0_60 = arith.constant 0 : index
    %c0_61 = arith.constant 0 : index
    %94 = vector.load %arg2[%c0_60, %c0_61] : memref<128x512xbf16, #tpu.memory_space<vmem>>, vector<128x512xbf16>
    %cst_62 = arith.constant dense<0.000000e+00> : vector<2x512xf32>
    %95 = tpu.matmul %93, %94, %cst_62 {dimension_numbers = #tpu.dot_dimension_numbers<[1], [0], [0], [1], [0, 0, 1, 1], [], []>} : vector<2x128xbf16>, vector<128x512xbf16>, vector<2x512xf32> -> vector<2x512xf32>
    %96 = arith.addf %92, %95 : vector<2x512xf32>
    %97 = vector.extract_strided_slice %96 {offsets = [0, 0], sizes = [2, 384], strides = [1, 1]} : vector<2x512xf32> to vector<2x384xf32>
    %98 = arith.negf %97 : vector<2x384xf32>
    %99 = math.exp %98 : vector<2x384xf32>
    %cst_63 = arith.constant 1.000000e+00 : f32
    %100 = vector.broadcast %cst_63 : f32 to vector<2x384xf32>
    %101 = arith.addf %100, %99 : vector<2x384xf32>
    %102 = arith.divf %100, %101 : vector<2x384xf32>
    %103 = vector.extract_strided_slice %102 {offsets = [0, 0], sizes = [2, 128], strides = [1, 1]} : vector<2x384xf32> to vector<2x128xf32>
    %104 = vector.extract_strided_slice %102 {offsets = [0, 128], sizes = [2, 128], strides = [1, 1]} : vector<2x384xf32> to vector<2x128xf32>
    %105 = vector.extract_strided_slice %102 {offsets = [0, 256], sizes = [2, 128], strides = [1, 1]} : vector<2x384xf32> to vector<2x128xf32>
    %106 = vector.extract_strided_slice %96 {offsets = [0, 384], sizes = [2, 128], strides = [1, 1]} : vector<2x512xf32> to vector<2x128xf32>
    %107 = math.tanh %106 : vector<2x128xf32>
    %108 = arith.mulf %104, %85 : vector<2x128xf32>
    %109 = arith.mulf %103, %107 : vector<2x128xf32>
    %110 = arith.addf %108, %109 : vector<2x128xf32>
    %111 = math.tanh %110 : vector<2x128xf32>
    %112 = arith.mulf %105, %111 : vector<2x128xf32>
    %113 = vector.broadcast %64 : vector<1x128xf32> to vector<2x128xf32>
    %114 = arith.mulf %112, %113 : vector<2x128xf32>
    %cst_64 = arith.constant dense<0.000000e+00> : vector<2xf32>
    %115 = vector.multi_reduction <add>, %114, %cst_64 [1] : vector<2x128xf32> to vector<2xf32>
    %116 = vector.shape_cast %115 : vector<2xf32> to vector<2x1xf32>
    %c4_65 = arith.constant 4 : index
    %c0_66 = arith.constant 0 : index
    %117 = vector.load %arg7[%c4_65, %c0_66] : memref<16x512xf32, #tpu.memory_space<vmem>>, vector<2x512xf32>
    %118 = arith.truncf %112 : vector<2x128xf32> to vector<2x128xbf16>
    %c0_67 = arith.constant 0 : index
    %c0_68 = arith.constant 0 : index
    %119 = vector.load %arg2[%c0_67, %c0_68] : memref<128x512xbf16, #tpu.memory_space<vmem>>, vector<128x512xbf16>
    %cst_69 = arith.constant dense<0.000000e+00> : vector<2x512xf32>
    %120 = tpu.matmul %118, %119, %cst_69 {dimension_numbers = #tpu.dot_dimension_numbers<[1], [0], [0], [1], [0, 0, 1, 1], [], []>} : vector<2x128xbf16>, vector<128x512xbf16>, vector<2x512xf32> -> vector<2x512xf32>
    %121 = arith.addf %117, %120 : vector<2x512xf32>
    %122 = vector.extract_strided_slice %121 {offsets = [0, 0], sizes = [2, 384], strides = [1, 1]} : vector<2x512xf32> to vector<2x384xf32>
    %123 = arith.negf %122 : vector<2x384xf32>
    %124 = math.exp %123 : vector<2x384xf32>
    %cst_70 = arith.constant 1.000000e+00 : f32
    %125 = vector.broadcast %cst_70 : f32 to vector<2x384xf32>
    %126 = arith.addf %125, %124 : vector<2x384xf32>
    %127 = arith.divf %125, %126 : vector<2x384xf32>
    %128 = vector.extract_strided_slice %127 {offsets = [0, 0], sizes = [2, 128], strides = [1, 1]} : vector<2x384xf32> to vector<2x128xf32>
    %129 = vector.extract_strided_slice %127 {offsets = [0, 128], sizes = [2, 128], strides = [1, 1]} : vector<2x384xf32> to vector<2x128xf32>
    %130 = vector.extract_strided_slice %127 {offsets = [0, 256], sizes = [2, 128], strides = [1, 1]} : vector<2x384xf32> to vector<2x128xf32>
    %131 = vector.extract_strided_slice %121 {offsets = [0, 384], sizes = [2, 128], strides = [1, 1]} : vector<2x512xf32> to vector<2x128xf32>
    %132 = math.tanh %131 : vector<2x128xf32>
    %133 = arith.mulf %129, %110 : vector<2x128xf32>
    %134 = arith.mulf %128, %132 : vector<2x128xf32>
    %135 = arith.addf %133, %134 : vector<2x128xf32>
    %136 = math.tanh %135 : vector<2x128xf32>
    %137 = arith.mulf %130, %136 : vector<2x128xf32>
    %138 = vector.broadcast %64 : vector<1x128xf32> to vector<2x128xf32>
    %139 = arith.mulf %137, %138 : vector<2x128xf32>
    %cst_71 = arith.constant dense<0.000000e+00> : vector<2xf32>
    %140 = vector.multi_reduction <add>, %139, %cst_71 [1] : vector<2x128xf32> to vector<2xf32>
    %141 = vector.shape_cast %140 : vector<2xf32> to vector<2x1xf32>
    %c6_72 = arith.constant 6 : index
    %c0_73 = arith.constant 0 : index
    %142 = vector.load %arg7[%c6_72, %c0_73] : memref<16x512xf32, #tpu.memory_space<vmem>>, vector<2x512xf32>
    %143 = arith.truncf %137 : vector<2x128xf32> to vector<2x128xbf16>
    %c0_74 = arith.constant 0 : index
    %c0_75 = arith.constant 0 : index
    %144 = vector.load %arg2[%c0_74, %c0_75] : memref<128x512xbf16, #tpu.memory_space<vmem>>, vector<128x512xbf16>
    %cst_76 = arith.constant dense<0.000000e+00> : vector<2x512xf32>
    %145 = tpu.matmul %143, %144, %cst_76 {dimension_numbers = #tpu.dot_dimension_numbers<[1], [0], [0], [1], [0, 0, 1, 1], [], []>} : vector<2x128xbf16>, vector<128x512xbf16>, vector<2x512xf32> -> vector<2x512xf32>
    %146 = arith.addf %142, %145 : vector<2x512xf32>
    %147 = vector.extract_strided_slice %146 {offsets = [0, 0], sizes = [2, 384], strides = [1, 1]} : vector<2x512xf32> to vector<2x384xf32>
    %148 = arith.negf %147 : vector<2x384xf32>
    %149 = math.exp %148 : vector<2x384xf32>
    %cst_77 = arith.constant 1.000000e+00 : f32
    %150 = vector.broadcast %cst_77 : f32 to vector<2x384xf32>
    %151 = arith.addf %150, %149 : vector<2x384xf32>
    %152 = arith.divf %150, %151 : vector<2x384xf32>
    %153 = vector.extract_strided_slice %152 {offsets = [0, 0], sizes = [2, 128], strides = [1, 1]} : vector<2x384xf32> to vector<2x128xf32>
    %154 = vector.extract_strided_slice %152 {offsets = [0, 128], sizes = [2, 128], strides = [1, 1]} : vector<2x384xf32> to vector<2x128xf32>
    %155 = vector.extract_strided_slice %152 {offsets = [0, 256], sizes = [2, 128], strides = [1, 1]} : vector<2x384xf32> to vector<2x128xf32>
    %156 = vector.extract_strided_slice %146 {offsets = [0, 384], sizes = [2, 128], strides = [1, 1]} : vector<2x512xf32> to vector<2x128xf32>
    %157 = math.tanh %156 : vector<2x128xf32>
    %158 = arith.mulf %154, %135 : vector<2x128xf32>
    %159 = arith.mulf %153, %157 : vector<2x128xf32>
    %160 = arith.addf %158, %159 : vector<2x128xf32>
    %161 = math.tanh %160 : vector<2x128xf32>
    %162 = arith.mulf %155, %161 : vector<2x128xf32>
    %163 = vector.broadcast %64 : vector<1x128xf32> to vector<2x128xf32>
    %164 = arith.mulf %162, %163 : vector<2x128xf32>
    %cst_78 = arith.constant dense<0.000000e+00> : vector<2xf32>
    %165 = vector.multi_reduction <add>, %164, %cst_78 [1] : vector<2x128xf32> to vector<2xf32>
    %166 = vector.shape_cast %165 : vector<2xf32> to vector<2x1xf32>
    %c8_79 = arith.constant 8 : index
    %c0_80 = arith.constant 0 : index
    %167 = vector.load %arg7[%c8_79, %c0_80] : memref<16x512xf32, #tpu.memory_space<vmem>>, vector<2x512xf32>
    %168 = arith.truncf %162 : vector<2x128xf32> to vector<2x128xbf16>
    %c0_81 = arith.constant 0 : index
    %c0_82 = arith.constant 0 : index
    %169 = vector.load %arg2[%c0_81, %c0_82] : memref<128x512xbf16, #tpu.memory_space<vmem>>, vector<128x512xbf16>
    %cst_83 = arith.constant dense<0.000000e+00> : vector<2x512xf32>
    %170 = tpu.matmul %168, %169, %cst_83 {dimension_numbers = #tpu.dot_dimension_numbers<[1], [0], [0], [1], [0, 0, 1, 1], [], []>} : vector<2x128xbf16>, vector<128x512xbf16>, vector<2x512xf32> -> vector<2x512xf32>
    %171 = arith.addf %167, %170 : vector<2x512xf32>
    %172 = vector.extract_strided_slice %171 {offsets = [0, 0], sizes = [2, 384], strides = [1, 1]} : vector<2x512xf32> to vector<2x384xf32>
    %173 = arith.negf %172 : vector<2x384xf32>
    %174 = math.exp %173 : vector<2x384xf32>
    %cst_84 = arith.constant 1.000000e+00 : f32
    %175 = vector.broadcast %cst_84 : f32 to vector<2x384xf32>
    %176 = arith.addf %175, %174 : vector<2x384xf32>
    %177 = arith.divf %175, %176 : vector<2x384xf32>
    %178 = vector.extract_strided_slice %177 {offsets = [0, 0], sizes = [2, 128], strides = [1, 1]} : vector<2x384xf32> to vector<2x128xf32>
    %179 = vector.extract_strided_slice %177 {offsets = [0, 128], sizes = [2, 128], strides = [1, 1]} : vector<2x384xf32> to vector<2x128xf32>
    %180 = vector.extract_strided_slice %177 {offsets = [0, 256], sizes = [2, 128], strides = [1, 1]} : vector<2x384xf32> to vector<2x128xf32>
    %181 = vector.extract_strided_slice %171 {offsets = [0, 384], sizes = [2, 128], strides = [1, 1]} : vector<2x512xf32> to vector<2x128xf32>
    %182 = math.tanh %181 : vector<2x128xf32>
    %183 = arith.mulf %179, %160 : vector<2x128xf32>
    %184 = arith.mulf %178, %182 : vector<2x128xf32>
    %185 = arith.addf %183, %184 : vector<2x128xf32>
    %186 = math.tanh %185 : vector<2x128xf32>
    %187 = arith.mulf %180, %186 : vector<2x128xf32>
    %188 = vector.broadcast %64 : vector<1x128xf32> to vector<2x128xf32>
    %189 = arith.mulf %187, %188 : vector<2x128xf32>
    %cst_85 = arith.constant dense<0.000000e+00> : vector<2xf32>
    %190 = vector.multi_reduction <add>, %189, %cst_85 [1] : vector<2x128xf32> to vector<2xf32>
    %191 = vector.shape_cast %190 : vector<2xf32> to vector<2x1xf32>
    %c10_86 = arith.constant 10 : index
    %c0_87 = arith.constant 0 : index
    %192 = vector.load %arg7[%c10_86, %c0_87] : memref<16x512xf32, #tpu.memory_space<vmem>>, vector<2x512xf32>
    %193 = arith.truncf %187 : vector<2x128xf32> to vector<2x128xbf16>
    %c0_88 = arith.constant 0 : index
    %c0_89 = arith.constant 0 : index
    %194 = vector.load %arg2[%c0_88, %c0_89] : memref<128x512xbf16, #tpu.memory_space<vmem>>, vector<128x512xbf16>
    %cst_90 = arith.constant dense<0.000000e+00> : vector<2x512xf32>
    %195 = tpu.matmul %193, %194, %cst_90 {dimension_numbers = #tpu.dot_dimension_numbers<[1], [0], [0], [1], [0, 0, 1, 1], [], []>} : vector<2x128xbf16>, vector<128x512xbf16>, vector<2x512xf32> -> vector<2x512xf32>
    %196 = arith.addf %192, %195 : vector<2x512xf32>
    %197 = vector.extract_strided_slice %196 {offsets = [0, 0], sizes = [2, 384], strides = [1, 1]} : vector<2x512xf32> to vector<2x384xf32>
    %198 = arith.negf %197 : vector<2x384xf32>
    %199 = math.exp %198 : vector<2x384xf32>
    %cst_91 = arith.constant 1.000000e+00 : f32
    %200 = vector.broadcast %cst_91 : f32 to vector<2x384xf32>
    %201 = arith.addf %200, %199 : vector<2x384xf32>
    %202 = arith.divf %200, %201 : vector<2x384xf32>
    %203 = vector.extract_strided_slice %202 {offsets = [0, 0], sizes = [2, 128], strides = [1, 1]} : vector<2x384xf32> to vector<2x128xf32>
    %204 = vector.extract_strided_slice %202 {offsets = [0, 128], sizes = [2, 128], strides = [1, 1]} : vector<2x384xf32> to vector<2x128xf32>
    %205 = vector.extract_strided_slice %202 {offsets = [0, 256], sizes = [2, 128], strides = [1, 1]} : vector<2x384xf32> to vector<2x128xf32>
    %206 = vector.extract_strided_slice %196 {offsets = [0, 384], sizes = [2, 128], strides = [1, 1]} : vector<2x512xf32> to vector<2x128xf32>
    %207 = math.tanh %206 : vector<2x128xf32>
    %208 = arith.mulf %204, %185 : vector<2x128xf32>
    %209 = arith.mulf %203, %207 : vector<2x128xf32>
    %210 = arith.addf %208, %209 : vector<2x128xf32>
    %211 = math.tanh %210 : vector<2x128xf32>
    %212 = arith.mulf %205, %211 : vector<2x128xf32>
    %213 = vector.broadcast %64 : vector<1x128xf32> to vector<2x128xf32>
    %214 = arith.mulf %212, %213 : vector<2x128xf32>
    %cst_92 = arith.constant dense<0.000000e+00> : vector<2xf32>
    %215 = vector.multi_reduction <add>, %214, %cst_92 [1] : vector<2x128xf32> to vector<2xf32>
    %216 = vector.shape_cast %215 : vector<2xf32> to vector<2x1xf32>
    %c12_93 = arith.constant 12 : index
    %c0_94 = arith.constant 0 : index
    %217 = vector.load %arg7[%c12_93, %c0_94] : memref<16x512xf32, #tpu.memory_space<vmem>>, vector<2x512xf32>
    %218 = arith.truncf %212 : vector<2x128xf32> to vector<2x128xbf16>
    %c0_95 = arith.constant 0 : index
    %c0_96 = arith.constant 0 : index
    %219 = vector.load %arg2[%c0_95, %c0_96] : memref<128x512xbf16, #tpu.memory_space<vmem>>, vector<128x512xbf16>
    %cst_97 = arith.constant dense<0.000000e+00> : vector<2x512xf32>
    %220 = tpu.matmul %218, %219, %cst_97 {dimension_numbers = #tpu.dot_dimension_numbers<[1], [0], [0], [1], [0, 0, 1, 1], [], []>} : vector<2x128xbf16>, vector<128x512xbf16>, vector<2x512xf32> -> vector<2x512xf32>
    %221 = arith.addf %217, %220 : vector<2x512xf32>
    %222 = vector.extract_strided_slice %221 {offsets = [0, 0], sizes = [2, 384], strides = [1, 1]} : vector<2x512xf32> to vector<2x384xf32>
    %223 = arith.negf %222 : vector<2x384xf32>
    %224 = math.exp %223 : vector<2x384xf32>
    %cst_98 = arith.constant 1.000000e+00 : f32
    %225 = vector.broadcast %cst_98 : f32 to vector<2x384xf32>
    %226 = arith.addf %225, %224 : vector<2x384xf32>
    %227 = arith.divf %225, %226 : vector<2x384xf32>
    %228 = vector.extract_strided_slice %227 {offsets = [0, 0], sizes = [2, 128], strides = [1, 1]} : vector<2x384xf32> to vector<2x128xf32>
    %229 = vector.extract_strided_slice %227 {offsets = [0, 128], sizes = [2, 128], strides = [1, 1]} : vector<2x384xf32> to vector<2x128xf32>
    %230 = vector.extract_strided_slice %227 {offsets = [0, 256], sizes = [2, 128], strides = [1, 1]} : vector<2x384xf32> to vector<2x128xf32>
    %231 = vector.extract_strided_slice %221 {offsets = [0, 384], sizes = [2, 128], strides = [1, 1]} : vector<2x512xf32> to vector<2x128xf32>
    %232 = math.tanh %231 : vector<2x128xf32>
    %233 = arith.mulf %229, %210 : vector<2x128xf32>
    %234 = arith.mulf %228, %232 : vector<2x128xf32>
    %235 = arith.addf %233, %234 : vector<2x128xf32>
    %236 = math.tanh %235 : vector<2x128xf32>
    %237 = arith.mulf %230, %236 : vector<2x128xf32>
    %238 = vector.broadcast %64 : vector<1x128xf32> to vector<2x128xf32>
    %239 = arith.mulf %237, %238 : vector<2x128xf32>
    %cst_99 = arith.constant dense<0.000000e+00> : vector<2xf32>
    %240 = vector.multi_reduction <add>, %239, %cst_99 [1] : vector<2x128xf32> to vector<2xf32>
    %241 = vector.shape_cast %240 : vector<2xf32> to vector<2x1xf32>
    %c14_100 = arith.constant 14 : index
    %c0_101 = arith.constant 0 : index
    %242 = vector.load %arg7[%c14_100, %c0_101] : memref<16x512xf32, #tpu.memory_space<vmem>>, vector<2x512xf32>
    %243 = arith.truncf %237 : vector<2x128xf32> to vector<2x128xbf16>
    %c0_102 = arith.constant 0 : index
    %c0_103 = arith.constant 0 : index
    %244 = vector.load %arg2[%c0_102, %c0_103] : memref<128x512xbf16, #tpu.memory_space<vmem>>, vector<128x512xbf16>
    %cst_104 = arith.constant dense<0.000000e+00> : vector<2x512xf32>
    %245 = tpu.matmul %243, %244, %cst_104 {dimension_numbers = #tpu.dot_dimension_numbers<[1], [0], [0], [1], [0, 0, 1, 1], [], []>} : vector<2x128xbf16>, vector<128x512xbf16>, vector<2x512xf32> -> vector<2x512xf32>
    %246 = arith.addf %242, %245 : vector<2x512xf32>
    %247 = vector.extract_strided_slice %246 {offsets = [0, 0], sizes = [2, 384], strides = [1, 1]} : vector<2x512xf32> to vector<2x384xf32>
    %248 = arith.negf %247 : vector<2x384xf32>
    %249 = math.exp %248 : vector<2x384xf32>
    %cst_105 = arith.constant 1.000000e+00 : f32
    %250 = vector.broadcast %cst_105 : f32 to vector<2x384xf32>
    %251 = arith.addf %250, %249 : vector<2x384xf32>
    %252 = arith.divf %250, %251 : vector<2x384xf32>
    %253 = vector.extract_strided_slice %252 {offsets = [0, 0], sizes = [2, 128], strides = [1, 1]} : vector<2x384xf32> to vector<2x128xf32>
    %254 = vector.extract_strided_slice %252 {offsets = [0, 128], sizes = [2, 128], strides = [1, 1]} : vector<2x384xf32> to vector<2x128xf32>
    %255 = vector.extract_strided_slice %252 {offsets = [0, 256], sizes = [2, 128], strides = [1, 1]} : vector<2x384xf32> to vector<2x128xf32>
    %256 = vector.extract_strided_slice %246 {offsets = [0, 384], sizes = [2, 128], strides = [1, 1]} : vector<2x512xf32> to vector<2x128xf32>
    %257 = math.tanh %256 : vector<2x128xf32>
    %258 = arith.mulf %254, %235 : vector<2x128xf32>
    %259 = arith.mulf %253, %257 : vector<2x128xf32>
    %260 = arith.addf %258, %259 : vector<2x128xf32>
    %261 = math.tanh %260 : vector<2x128xf32>
    %262 = arith.mulf %255, %261 : vector<2x128xf32>
    %263 = vector.broadcast %64 : vector<1x128xf32> to vector<2x128xf32>
    %264 = arith.mulf %262, %263 : vector<2x128xf32>
    %cst_106 = arith.constant dense<0.000000e+00> : vector<2xf32>
    %265 = vector.multi_reduction <add>, %264, %cst_106 [1] : vector<2x128xf32> to vector<2xf32>
    %266 = vector.shape_cast %265 : vector<2xf32> to vector<2x1xf32>
    %267 = tpu.concatenate %91, %116, %141, %166, %191, %216, %241, %266 in 1 : vector<2x1xf32>, vector<2x1xf32>, vector<2x1xf32>, vector<2x1xf32>, vector<2x1xf32>, vector<2x1xf32>, vector<2x1xf32>, vector<2x1xf32> -> vector<2x8xf32>
    %cst_107 = arith.constant dense<0xFF800000> : vector<2xf32>
    %268 = vector.multi_reduction <maximumf>, %267, %cst_107 [1] : vector<2x8xf32> to vector<2xf32>
    %269 = vector.shape_cast %268 : vector<2xf32> to vector<2x1xf32>
    %270 = vector.broadcast %269 : vector<2x1xf32> to vector<2x8xf32>
    %271 = arith.subf %267, %270 : vector<2x8xf32>
    %272 = math.exp %271 : vector<2x8xf32>
    %cst_108 = arith.constant dense<0.000000e+00> : vector<2xf32>
    %273 = vector.multi_reduction <add>, %272, %cst_108 [1] : vector<2x8xf32> to vector<2xf32>
    %274 = vector.shape_cast %273 : vector<2xf32> to vector<2x1xf32>
    %275 = tpu.reciprocal %274 {approx = true} : vector<2x1xf32> -> vector<2x1xf32>
    %276 = vector.broadcast %275 : vector<2x1xf32> to vector<2x8xf32>
    %277 = arith.mulf %272, %276 : vector<2x8xf32>
    %278 = vector.extract_strided_slice %277 {offsets = [0, 0], sizes = [2, 1], strides = [1, 1]} : vector<2x8xf32> to vector<2x1xf32>
    %279 = vector.broadcast %278 : vector<2x1xf32> to vector<2x128xf32>
    %280 = arith.mulf %279, %87 : vector<2x128xf32>
    %281 = vector.extract_strided_slice %277 {offsets = [0, 1], sizes = [2, 1], strides = [1, 1]} : vector<2x8xf32> to vector<2x1xf32>
    %282 = vector.broadcast %281 : vector<2x1xf32> to vector<2x128xf32>
    %283 = arith.mulf %282, %112 : vector<2x128xf32>
    %284 = arith.addf %280, %283 : vector<2x128xf32>
    %285 = vector.extract_strided_slice %277 {offsets = [0, 2], sizes = [2, 1], strides = [1, 1]} : vector<2x8xf32> to vector<2x1xf32>
    %286 = vector.broadcast %285 : vector<2x1xf32> to vector<2x128xf32>
    %287 = arith.mulf %286, %137 : vector<2x128xf32>
    %288 = arith.addf %284, %287 : vector<2x128xf32>
    %289 = vector.extract_strided_slice %277 {offsets = [0, 3], sizes = [2, 1], strides = [1, 1]} : vector<2x8xf32> to vector<2x1xf32>
    %290 = vector.broadcast %289 : vector<2x1xf32> to vector<2x128xf32>
    %291 = arith.mulf %290, %162 : vector<2x128xf32>
    %292 = arith.addf %288, %291 : vector<2x128xf32>
    %293 = vector.extract_strided_slice %277 {offsets = [0, 4], sizes = [2, 1], strides = [1, 1]} : vector<2x8xf32> to vector<2x1xf32>
    %294 = vector.broadcast %293 : vector<2x1xf32> to vector<2x128xf32>
    %295 = arith.mulf %294, %187 : vector<2x128xf32>
    %296 = arith.addf %292, %295 : vector<2x128xf32>
    %297 = vector.extract_strided_slice %277 {offsets = [0, 5], sizes = [2, 1], strides = [1, 1]} : vector<2x8xf32> to vector<2x1xf32>
    %298 = vector.broadcast %297 : vector<2x1xf32> to vector<2x128xf32>
    %299 = arith.mulf %298, %212 : vector<2x128xf32>
    %300 = arith.addf %296, %299 : vector<2x128xf32>
    %301 = vector.extract_strided_slice %277 {offsets = [0, 6], sizes = [2, 1], strides = [1, 1]} : vector<2x8xf32> to vector<2x1xf32>
    %302 = vector.broadcast %301 : vector<2x1xf32> to vector<2x128xf32>
    %303 = arith.mulf %302, %237 : vector<2x128xf32>
    %304 = arith.addf %300, %303 : vector<2x128xf32>
    %305 = vector.extract_strided_slice %277 {offsets = [0, 7], sizes = [2, 1], strides = [1, 1]} : vector<2x8xf32> to vector<2x1xf32>
    %306 = vector.broadcast %305 : vector<2x1xf32> to vector<2x128xf32>
    %307 = arith.mulf %306, %262 : vector<2x128xf32>
    %308 = arith.addf %304, %307 : vector<2x128xf32>
    %309 = arith.truncf %308 : vector<2x128xf32> to vector<2x128xbf16>
    %c0_109 = arith.constant 0 : index
    %c0_110 = arith.constant 0 : index
    %310 = vector.load %arg4[%c0_109, %c0_110] : memref<128x128xbf16, #tpu.memory_space<vmem>>, vector<128x128xbf16>
    %cst_111 = arith.constant dense<0.000000e+00> : vector<2x128xf32>
    %311 = tpu.matmul %309, %310, %cst_111 {dimension_numbers = #tpu.dot_dimension_numbers<[1], [0], [0], [1], [0, 0, 1, 1], [], []>} : vector<2x128xbf16>, vector<128x128xbf16>, vector<2x128xf32> -> vector<2x128xf32>
    %c0_112 = arith.constant 0 : index
    %c0_113 = arith.constant 0 : index
    %312 = vector.load %arg5[%c0_112, %c0_113] : memref<1x128xf32, #tpu.memory_space<vmem>>, vector<1x128xf32>
    %313 = vector.broadcast %312 : vector<1x128xf32> to vector<2x128xf32>
    %314 = arith.addf %311, %313 : vector<2x128xf32>
    %c0_114 = arith.constant 0 : index
    %c0_115 = arith.constant 0 : index
    %315 = vector.load %arg6[%c0_114, %c0_115] : memref<2x128xf32, #tpu.memory_space<vmem>>, vector<2x128xf32>
    tpu.vector_store %arg6[%c0_114, %c0_115], %314 {strides = array<i32>} : memref<2x128xf32, #tpu.memory_space<vmem>>, vector<2x128xf32>,
    return
  }
}

</mosaic_0001>

<bundles_post_ra>
// kernel: atae_lstm_forward.1
= control target key start
LH: loop header
LB: loop body
LE: loop exit
PB: predicated region body
PF: predicated region fallthrough
CT: control target
= control target key end

     0   :  { %11 = vsyncpa [#allocation5], 0  ;;  %s2935_s0 = inlined_call_operand.vmem [shape: s32[16], index: 0, kind: input, shape index: {}]   ;;  %s2936_s1 = inlined_call_operand.hbm [shape: f32[50,512], index: 1, kind: input, shape index: {}]   ;;  %s2937_s2 = inlined_call_operand.hbm [shape: bf16[128,512], index: 2, kind: input, shape index: {}]   ;;  %s2938_s3 = inlined_call_operand.vmem [shape: f32[1,128], index: 3, kind: input, shape index: {}]   ;;  %s2939_s4 = inlined_call_operand.hbm [shape: bf16[128,128], index: 4, kind: input, shape index: {}]   ;;  %s2940_s5 = inlined_call_operand.vmem [shape: f32[1,128], index: 5, kind: input, shape index: {}]   ;;  %s2941_s6 = inlined_call_operand.vmem [shape: f32[2,128], index: 6, kind: output, shape index: {}]  }
   0x1   :  { %12 = vsyncpa [#allocation4], 0 }
   0x2   :  { %13 = vsyncpa [#allocation8], 0  ;;  %s2315_s21 = smov [#allocation7]   ;;  %s20_s25 = sshll.u32 %s2935_s0, 4  ;;  %s21_s25 = int_to_ptr.vmem [resolvable:$true] %s20_s25 }
   0x3   :  { %s41_s22 = sshll.u32 %s2315_s21, 4  ;;  %s42_s22 = int_to_ptr.vmem [resolvable:$true] %s41_s22 }
   0x4   :  { %s2245_s26 = scalar_lea.vmem %s42_s22, 4096  ;;  %p2250_p1 = scmp.lt.s32.totalorder %s42_s22, %s42_s22 }
   0x5   :  { %p2246_p0 = scmp.ne.s32.totalorder %s42_s22, %s2245_s26  ;;  %p2251_p2 = scmp.lt.s32.totalorder %s2245_s26, %s2245_s26 }
   0x7   :  { %p2252_p3 = por %p2251_p2, %p2250_p1 }
   0x9   :  { %p2253_p4 = pnand %p2252_p3, %p2246_p0 }
   0xb   :  { %2256 = shalt.err (!%p2253_p4)
}
   0xc   :  { %s2316_s27 = smov 256   ;;  %s2317_s28 = smov 16  }
   0xd   :  { %47 = dma.hbm_to_vmem [thread:$0]  %s2937_s2, 4096, %s42_s22, [#allocation8], %s2316_s27, %s2316_s27, %s2317_s28  }
   0xe   :  { %s2257_s7 = scalar_lea.vmem %s21_s25, 16  ;;  %p2262_p6 = scmp.lt.s32.totalorder %s21_s25, %s21_s25 }
   0xf   :  { %p2258_p5 = scmp.ne.s32.totalorder %s21_s25, %s2257_s7  ;;  %p2263_p7 = scmp.lt.s32.totalorder %s2257_s7, %s2257_s7 }
  0x11   :  { %p2264_p8 = por %p2263_p7, %p2262_p6 }
  0x13   :  { %p2265_p9 = pnand %p2264_p8, %p2258_p5 }
  0x15   :  { %2268 = shalt.err (!%p2265_p9)
}
  0x16   :  { %s2318_s0 = smov [#allocation3]   ;;  %s2319_s8 = smov [#allocation6]  }
  0x17   :  { %23 = dma.vmem_to_smem %s21_s25, 16, %s2318_s0, [#allocation5]  }
  0x18   :  { %s29_s9 = sshll.u32 %s2319_s8, 4  ;;  %s30_s9 = int_to_ptr.vmem [resolvable:$true] %s29_s9 }
  0x19   :  { %s2277_s10 = scalar_lea.vmem %s30_s9, 3584  ;;  %p2282_p11 = scmp.lt.s32.totalorder %s30_s9, %s30_s9 }
  0x1a   :  { %p2278_p10 = scmp.ne.s32.totalorder %s30_s9, %s2277_s10  ;;  %p2283_p12 = scmp.lt.s32.totalorder %s2277_s10, %s2277_s10 }
  0x1c   :  { %p2284_p13 = por %p2283_p12, %p2282_p11 }
  0x1e   :  { %p2285_p0 = pnand %p2284_p13, %p2278_p10 }
  0x20   :  { %2288 = shalt.err (!%p2285_p0)
}
  0x21   :  { %s2320_s2 = smov 512   ;;  %s2321_s11 = smov 32  }
  0x22   :  { %35 = dma.hbm_to_vmem [thread:$0]  %s2936_s1, 3584, %s30_s9, [#allocation4], %s2320_s2, %s2320_s2, %s2321_s11  }
  0x23   :  { %s2322_s14 = smov [#allocation9]  }
  0x24   :  { %s55_s15 = sshll.u32 %s2322_s14, 4  ;;  %s56_s15 = int_to_ptr.vmem [resolvable:$true] %s55_s15 }
  0x25   :  { %s2297_s16 = scalar_lea.vmem %s56_s15, 1024  ;;  %p2302_p2 = scmp.lt.s32.totalorder %s56_s15, %s56_s15 }
  0x26   :  { %p2298_p1 = scmp.ne.s32.totalorder %s56_s15, %s2297_s16  ;;  %p2303_p3 = scmp.lt.s32.totalorder %s2297_s16, %s2297_s16 }
  0x28   :  { %p2304_p4 = por %p2303_p3, %p2302_p2 }
  0x2a   :  { %p2305_p5 = pnand %p2304_p4, %p2298_p1 }
  0x2c   :  { %2308 = shalt.err (!%p2305_p5)
}
  0x2d   :  { %s2323_s17 = smov 64   ;;  %s2324_s18 = smov 4  }
  0x2e   :  { %61 = dma.hbm_to_vmem [thread:$0]  %s2939_s4, 1024, %s56_s15, [#allocation8], %s2323_s17, %s2323_s17, %s2324_s18  }
  0x2f   :  { %2309 = dma.done.wait [#allocation5], 16  }
  0x30   :  { %2310 = vsyncadd [#allocation5], 4294967280 }
  0x31   :  { %2311 = dma.done.wait [#allocation4], 3584  }
  0x32   :  { %2312 = vsyncadd [#allocation4], 4294963712 }
  0x33   :  { %2313 = dma.done.wait [#allocation8], 5120  }
  0x34   :  { %2314 = vsyncadd [#allocation8], 4294962176 }
  0x35   :  { %76 = sfence }
  0x36   :  { %v2382_v0 = vld [vmem:[#allocation7 + $0xe4] ss:$16 sps:$4 sm:$0xff]   ;;  %v2384_v1 = vld [vmem:[#allocation7 + $0xe0] ss:$16 sps:$4 sm:$0xff]   ;;  %v2325_v2 = vmov 0   ;;  %s2388_s1 = sld [smem:[#allocation3]]  ;;  %v88_v17 = vlaneseq }
  0x37   :  { %518 = vmatprep.mubr.bf16.mxu0 %v2325_v2  ;;  %559 = vmatprep.mubr.bf16.mxu1 %v2325_v2  ;;  %v2391_v3 = vld [vmem:[#allocation7 + $0xc4] ss:$16 sps:$4 sm:$0xff]   ;;  %v2395_v4 = vld [vmem:[#allocation7 + $0xc0] ss:$16 sps:$4 sm:$0xff]   ;;  %s2400_s4 = sld [smem:[#allocation3 + $0x1]]  ;;  %vm603_vm1 = vcmask 1041408  }
  0x38   :  { %486 = vmatprep.subr.bf16.mxu0 %v2382_v0  ;;  %2007 = vset.pattern.permute.xlu0 %v2325_v2  ;;  %v2398_v5 = vld [vmem:[#allocation7 + $0xa4] ss:$16 sps:$4 sm:$0xff]   ;;  %v2402_v6 = vld [vmem:[#allocation7 + $0xec] ss:$16 sps:$4 sm:$0xff]   ;;  %v2404_v7 = vld [vmem:[#allocation7 + $0xe8] ss:$16 sps:$4 sm:$0xff]  }
  0x39   :  { %487 = vmatpush1.bf16.msra.mxu0 %v2384_v1  ;;  %v2407_v8 = vld [vmem:[#allocation7 + $0xa0] ss:$16 sps:$4 sm:$0xff]   ;;  %527 = vmatprep.subr.bf16.mxu1 %v2402_v6  ;;  %v2411_v9 = vld [vmem:[#allocation7 + $0x84] ss:$16 sps:$4 sm:$0xff]   ;;  %v2414_v10 = vld [vmem:[#allocation7 + $0xcc] ss:$16 sps:$4 sm:$0xff]  }
  0x3a   :  { %488 = vmatprep.subr.bf16.mxu0 %v2391_v3  ;;  %528 = vmatpush1.bf16.msra.mxu1 %v2404_v7  ;;  %v2416_v11 = vld [vmem:[#allocation7 + $0xc8] ss:$16 sps:$4 sm:$0xff]   ;;  %v2422_v12 = vld [vmem:[#allocation7 + $0x80] ss:$16 sps:$4 sm:$0xff]   ;;  %v2424_v13 = vld [vmem:[#allocation7 + $0x64] ss:$16 sps:$4 sm:$0xff]  }
  0x3b   :  { %529 = vmatprep.subr.bf16.mxu1 %v2414_v10  ;;  %v2426_v14 = vld [vmem:[#allocation7 + $0xac] ss:$16 sps:$4 sm:$0xff]   ;;  %v2430_v15 = vld [vmem:[#allocation7 + $0xa8] ss:$16 sps:$4 sm:$0xff]   ;;  %v2438_v18 = vld [vmem:[#allocation7 + $0x60] ss:$16 sps:$4 sm:$0xff]  }
  0x3c   :  { %s79_s21 = sshra.s32 %s2388_s1, 3  ;;  %s82_s23 = sand.u32 7, %s2388_s1  ;;  %v2434_v16 = vld [vmem:[#allocation7 + $0x8c] ss:$16 sps:$4 sm:$0xff]   ;;  %v2441_v19 = vld [vmem:[#allocation7 + $0x44] ss:$16 sps:$4 sm:$0xff]  }
  0x3d   :  { %489 = vmatpush1.bf16.msra.mxu0 %v2395_v4  ;;  %s95_s22 = sshra.s32 %s2400_s4, 3  ;;  %s1942_s24 = sshll.u32 %s79_s21, 5  ;;  %v2444_v20 = vld [vmem:[#allocation7 + $0x88] ss:$16 sps:$4 sm:$0xff]   ;;  %v2447_v21 = vld [vmem:[#allocation7 + $0x6c] ss:$16 sps:$4 sm:$0xff]  }
  0x3e   :  { %490 = vmatprep.subr.bf16.mxu0 %v2398_v5  ;;  %530 = vmatpush1.bf16.msra.mxu1 %v2416_v11  ;;  %s98_s25 = sand.u32 7, %s2400_s4  ;;  %s1943_s26 = sshll.u32 %s95_s22, 5  ;;  %vm2449_vm0 = vcmp.lt.s32.totalorder %v88_v17, 512  ;;  %v2454_v23 = vld [vmem:[#allocation7 + $0x40] ss:$16 sps:$4 sm:$0xff]   ;;  %vm738_vm2 = vcmask 1043458  }
  0x3f   :  { %531 = vmatprep.subr.bf16.mxu1 %v2426_v14  ;;  %s85_s27 = sadd.s32 %s1942_s24, %s82_s23  ;;  %s101_s28 = sadd.s32 %s1943_s26, %s98_s25  ;;  %v2456_v24 = vld [vmem:[#allocation7 + $0x24] ss:$16 sps:$4 sm:$0xff]   ;;  %v2460_v25 = vld [vmem:[#allocation7 + $0x68] ss:$16 sps:$4 sm:$0xff]   ;;  %v2462_v26 = vld [vmem:[#allocation7 + $0x20] ss:$16 sps:$4 sm:$0xff]  }
  0x40   :  { %v2465_v27 = vld [vmem:[#allocation7 + $0x4c] ss:$16 sps:$4 sm:$0xff]   ;;  %s86_s29 = scalar_lea.vmem [#allocation6], %s85_s27  ;;  %v2467_v29 = vld [vmem:[#allocation7 + $0x4] ss:$16 sps:$4 sm:$0xff]   ;;  %s102_s30 = scalar_lea.vmem [#allocation6], %s101_s28 }
  0x41   :  { %491 = vmatpush1.bf16.msra.mxu0 %v2407_v8  ;;  %v87_v28 = vld [vmem:[%s86_s29] ss:$8 sm:$0xf]  ;;  %v2474_v32 = vld [vmem:[#allocation7 + $0x2c] ss:$16 sps:$4 sm:$0xff]   ;;  %s1834_s8 = sld [smem:[#allocation3 + $0x2]] }
  0x42   :  { %492 = vmatprep.subr.bf16.mxu0 %v2411_v9  ;;  %532 = vmatpush1.bf16.msra.mxu1 %v2430_v15  ;;  %v2469_v30 = vld [vmem:[#allocation7 + $0x48] ss:$16 sps:$4 sm:$0xff]   ;;  %92 = vst.msk [vmem:[#allocation2] ss:$8 sm:$0xf] %vm2449_vm0, %v87_v28  ;;  %s1837_s9 = sld [smem:[#allocation3 + $0x3]] }
  0x43   :  { %533 = vmatprep.subr.bf16.mxu1 %v2434_v16  ;;  %v103_v31 = vld [vmem:[%s102_s30] ss:$8 sm:$0xf]  ;;  %v2489_v35 = vld [vmem:[#allocation7 + $0xc] ss:$16 sps:$4 sm:$0xff]   ;;  %s1840_s19 = sld [smem:[#allocation3 + $0x4]] }
  0x44   :  { %105 = vst.msk [vmem:[#allocation2 + $0x1] ss:$8 sm:$0xf] %vm2449_vm0, %v103_v31  ;;  %v2480_v33 = vld [vmem:[#allocation7] ss:$16 sps:$4 sm:$0xff]   ;;  %s1843_s20 = sld [smem:[#allocation3 + $0x5]] }
  0x45   :  { %493 = vmatpush1.bf16.msra.mxu0 %v2422_v12  ;;  %v2486_v34 = vld [vmem:[#allocation7 + $0x28] ss:$16 sps:$4 sm:$0xff]   ;;  %vm876_vm3 = vcmask 1045508   ;;  %s1846_s29 = sld [smem:[#allocation3 + $0x6]]  ;;  %vm1014_vm4 = vcmask 1047558   ;;  %vm1569_vm5 = vcmask 7168  }
  0x46   :  { %494 = vmatprep.subr.bf16.mxu0 %v2424_v13  ;;  %534 = vmatpush1.bf16.msra.mxu1 %v2444_v20  ;;  %v2493_v36 = vld [vmem:[#allocation7 + $0x8] ss:$16 sps:$4 sm:$0xff]   ;;  %s1849_s30 = sld [smem:[#allocation3 + $0x7]]  ;;  %vm1571_vm6 = vcmask 15360   ;;  %vm1573_vm7 = vcmask 23552   ;;  %vm1575_vm8 = vcmask 31744  }
  0x47   :  { %535 = vmatprep.subr.bf16.mxu1 %v2447_v21  ;;  %s108_s10 = sshra.s32 %s1834_s8, 3  ;;  %s111_s2 = sand.u32 7, %s1834_s8  ;;  %vm1577_vm9 = vcmask 39936   ;;  %vm1579_vm10 = vcmask 48128   ;;  %vm1581_vm11 = vcmask 56320   ;;  %vm1583_vm12 = vcmask 58368  }
  0x48   :  { %s1944_s11 = sshll.u32 %s108_s10, 5  ;;  %s121_s12 = sshra.s32 %s1837_s9, 3  ;;  %vm2334_vm13 = vmmov 0  }
  0x49   :  { %495 = vmatpush1.bf16.msra.mxu0 %v2438_v18  ;;  %s114_s13 = sadd.s32 %s1944_s11, %s111_s2  ;;  %s124_s14 = sand.u32 7, %s1837_s9 }
  0x4a   :  { %496 = vmatprep.subr.bf16.mxu0 %v2441_v19  ;;  %536 = vmatpush1.bf16.msra.mxu1 %v2460_v25  ;;  %s1945_s15 = sshll.u32 %s121_s12, 5  ;;  %s115_s16 = scalar_lea.vmem [#allocation6], %s114_s13 }
  0x4b   :  { %537 = vmatprep.subr.bf16.mxu1 %v2465_v27  ;;  %v290_v37 = vld [vmem:[#allocation2] sm:$0x3]  ;;  %v291_v39 = vld [vmem:[#allocation2 + $0x8] sm:$0x3]  ;;  %v292_v49 = vld [vmem:[#allocation2 + $0x10] sm:$0x3]  ;;  %s127_s17 = sadd.s32 %s1945_s15, %s124_s14 }
  0x4c   :  { %v293_v53 = vld [vmem:[#allocation2 + $0x18] sm:$0x3]  ;;  %s128_s18 = scalar_lea.vmem [#allocation6], %s127_s17  ;;  %s134_s1 = sshra.s32 %s1840_s19, 3 }
  0x4d   :  { %497 = vmatpush1.bf16.msra.mxu0 %v2454_v23  ;;  %s137_s4 = sand.u32 7, %s1840_s19  ;;  %s1946_s21 = sshll.u32 %s134_s1, 5 }
  0x4e   :  { %498 = vmatprep.subr.bf16.mxu0 %v2456_v24  ;;  %538 = vmatpush1.bf16.msra.mxu1 %v2469_v30  ;;  %s147_s22 = sshra.s32 %s1843_s20, 3  ;;  %s140_s23 = sadd.s32 %s1946_s21, %s137_s4 }
  0x4f   :  { %539 = vmatprep.subr.bf16.mxu1 %v2474_v32  ;;  %s150_s24 = sand.u32 7, %s1843_s20  ;;  %s1947_s25 = sshll.u32 %s147_s22, 5 }
  0x50   :  { %s141_s26 = scalar_lea.vmem [#allocation6], %s140_s23  ;;  %s153_s27 = sadd.s32 %s1947_s25, %s150_s24 }
  0x51   :  { %499 = vmatpush1.bf16.msra.mxu0 %v2462_v26  ;;  %s154_s28 = scalar_lea.vmem [#allocation6], %s153_s27  ;;  %s160_s7 = sshra.s32 %s1846_s29, 3 }
  0x52   :  { %500 = vmatprep.subr.bf16.mxu0 %v2467_v29  ;;  %540 = vmatpush1.bf16.msra.mxu1 %v2486_v34  ;;  %s163_s0 = sand.u32 7, %s1846_s29  ;;  %s1948_s8 = sshll.u32 %s160_s7, 5 }
  0x53   :  { %541 = vmatprep.subr.bf16.mxu1 %v2489_v35  ;;  %s173_s9 = sshra.s32 %s1849_s30, 3  ;;  %s166_s10 = sadd.s32 %s1948_s8, %s163_s0 }
  0x54   :  { %s176_s2 = sand.u32 7, %s1849_s30  ;;  %s1949_s11 = sshll.u32 %s173_s9, 5 }
  0x55   :  { %501 = vmatpush1.bf16.msra.mxu0 %v2480_v33  ;;  %s167_s12 = scalar_lea.vmem [#allocation6], %s166_s10  ;;  %s179_s13 = sadd.s32 %s1949_s11, %s176_s2 }
  0x56   :  { %612 = vmatprep.subr.bf16.mxu0 %v2382_v0  ;;  %542 = vmatpush1.bf16.msra.mxu1 %v2493_v36  ;;  %s180_s14 = scalar_lea.vmem [#allocation6], %s179_s13  ;;  %s1852_s15 = sld [smem:[#allocation3 + $0x8]] }
  0x57   :  { %653 = vmatprep.subr.bf16.mxu1 %v2402_v6  ;;  %s1858_s25 = sld [smem:[#allocation3 + $0xa]] }
  0x58   :  { %519 = vmatmul.mubr.bf16.vlgmr.msra.gmra.mxu0 %v2325_v2  ;;  %s1867_s13 = sld [smem:[#allocation3 + $0xd]] }
  0x59   :  { %613 = vmatpush1.bf16.msra.mxu0 %v2384_v1  ;;  %644 = vmatprep.mubr.bf16.mxu0 %v2325_v2 }
  0x5a   :  { %614 = vmatprep.subr.bf16.mxu0 %v2391_v3  ;;  %560 = vmatmul.mubr.bf16.vlgmr.msra.gmra.mxu1 %v2325_v2 }
  0x5b   :  { %654 = vmatpush1.bf16.msra.mxu1 %v2404_v7  ;;  %685 = vmatprep.mubr.bf16.mxu1 %v2325_v2 }
  0x5c   :  { %655 = vmatprep.subr.bf16.mxu1 %v2414_v10  ;;  %s186_s17 = sshra.s32 %s1852_s15, 3 }
  0x5d   :  { %615 = vmatpush1.bf16.msra.mxu0 %v2395_v4  ;;  %s1950_s19 = sshll.u32 %s186_s17, 5  ;;  %s212_s27 = sshra.s32 %s1858_s25, 3 }
  0x5e   :  { %616 = vmatprep.subr.bf16.mxu0 %v2398_v5  ;;  %s1952_s29 = sshll.u32 %s212_s27, 5  ;;  %s251_s17 = sshra.s32 %s1867_s13, 3 }
  0x5f   :  { %656 = vmatpush1.bf16.msra.mxu1 %v2416_v11 }
  0x60   :  { %657 = vmatprep.subr.bf16.mxu1 %v2426_v14 }
  0x61   :  { %617 = vmatpush1.bf16.msra.mxu0 %v2407_v8 }
  0x62   :  { %618 = vmatprep.subr.bf16.mxu0 %v2411_v9 }
  0x63   :  { %658 = vmatpush1.bf16.msra.mxu1 %v2430_v15 }
  0x64   :  { %659 = vmatprep.subr.bf16.mxu1 %v2434_v16 }
  0x65   :  { %619 = vmatpush1.bf16.msra.mxu0 %v2422_v12 }
  0x66   :  { %620 = vmatprep.subr.bf16.mxu0 %v2424_v13 }
  0x67   :  { %660 = vmatpush1.bf16.msra.mxu1 %v2444_v20 }
  0x68   :  { %661 = vmatprep.subr.bf16.mxu1 %v2447_v21 }
  0x69   :  { %621 = vmatpush1.bf16.msra.mxu0 %v2438_v18 }
  0x6a   :  { %622 = vmatprep.subr.bf16.mxu0 %v2441_v19 }
  0x6b   :  { %662 = vmatpush1.bf16.msra.mxu1 %v2460_v25 }
  0x6c   :  { %663 = vmatprep.subr.bf16.mxu1 %v2465_v27 }
  0x6d   :  { %623 = vmatpush1.bf16.msra.mxu0 %v2454_v23 }
  0x6e   :  { %624 = vmatprep.subr.bf16.mxu0 %v2456_v24 }
  0x6f   :  { %664 = vmatpush1.bf16.msra.mxu1 %v2469_v30 }
  0x70   :  { %665 = vmatprep.subr.bf16.mxu1 %v2474_v32 }
  0x71   :  { %625 = vmatpush1.bf16.msra.mxu0 %v2462_v26 }
  0x72   :  { %626 = vmatprep.subr.bf16.mxu0 %v2467_v29 }
  0x73   :  { %666 = vmatpush1.bf16.msra.mxu1 %v2486_v34 }
  0x74   :  { %667 = vmatprep.subr.bf16.mxu1 %v2489_v35 }
  0x75   :  { %627 = vmatpush1.bf16.msra.mxu0 %v2480_v33 }
  0x76   :  { %750 = vmatprep.subr.bf16.mxu0 %v2382_v0 }
  0x77   :  { %668 = vmatpush1.bf16.msra.mxu1 %v2493_v36 }
  0x78   :  { %791 = vmatprep.subr.bf16.mxu1 %v2402_v6 }
 0x118   :  { %v520_v38 = vpop.f32.mrf.mxu0 }
 0x119   :  { %v568_v40 = vadd.f32 %v520_v38, %v290_v37 }
 0x11a   :  { %v522_v41 = vpop.f32.mrf.mxu0  ;;  %v561_v46 = vpop.f32.mrf.mxu1 }
 0x11b   :  { %v1908_v42 = vmul.f32 -1.442695, %v568_v40  ;;  %v569_v43 = vadd.f32 %v522_v41, %v291_v39  ;;  %v570_v51 = vadd.f32 %v561_v46, %v292_v49  ;;  %v2541_v40 = vld [vmem:[%s2938_s3] ss:$0 sm:$0xff] }
 0x11c   :  { %v524_v44 = vpop.f32.mrf.mxu0  ;;  %v563_v48 = vpop.f32.mrf.mxu1  ;;  %v129_v46 = vld [vmem:[%s128_s18] ss:$8 sm:$0xf]  ;;  %s189_s18 = sand.u32 7, %s1852_s15 }
 0x11d   :  { %2072 = vpow2.f32 %v1908_v42  ;;  %v1909_v45 = vmul.f32 -1.442695, %v569_v43  ;;  %v1910_v54 = vmul.f32 -1.442695, %v570_v51  ;;  %v571_v55 = vadd.f32 %v563_v48, %v293_v53  ;;  %s192_s1 = sadd.s32 %s1950_s19, %s189_s18  ;;  %s254_s19 = sand.u32 7, %s1867_s13 }
 0x11e   :  { %v525_v47 = vpop.f32.mrf.mxu0  ;;  %v565_v50 = vpop.f32.mrf.mxu1  ;;  %131 = vst.msk [vmem:[#allocation2 + $0x3] ss:$8 sm:$0xf] %vm2449_vm0, %v129_v46  ;;  %s193_s22 = scalar_lea.vmem [#allocation6], %s192_s1 }
 0x11f   :  { %2074 = vpow2.f32 %v1909_v45  ;;  %v116_v45 = vld [vmem:[%s115_s16] ss:$8 sm:$0xf]  ;;  %s1855_s16 = sld [smem:[#allocation3 + $0x9]] }
 0x120   :  { %v566_v52 = vpop.f32.mrf.mxu1  ;;  %2076 = vpow2.f32 %v1910_v54  ;;  %118 = vst.msk [vmem:[#allocation2 + $0x2] ss:$8 sm:$0xf] %vm2449_vm0, %v116_v45 }
 0x121   :  { %2078 = vtanh.f32 %v571_v55 }
 0x125   :  { %s199_s20 = sshra.s32 %s1855_s16, 3  ;;  %s202_s4 = sand.u32 7, %s1855_s16 }
 0x126   :  { %s1951_s21 = sshll.u32 %s199_s20, 5  ;;  %s1955_s20 = sshll.u32 %s251_s17, 5 }
 0x127   :  { %v607_v47 = vld [vmem:[#allocation2] sm:$0xc]  ;;  %v608_v51 = vld [vmem:[#allocation2 + $0x8] sm:$0xc]  ;;  %s205_s23 = sadd.s32 %s1951_s21, %s202_s4  ;;  %s257_s4 = sadd.s32 %s1955_s20, %s254_s19 }
 0x128   :  { %s206_s24 = scalar_lea.vmem [#allocation6], %s205_s23  ;;  %s258_s21 = scalar_lea.vmem [#allocation6], %s257_s4 }
 0x129   :  { %s1873_s23 = sld [smem:[#allocation3 + $0xf]] }
 0x12a   :  { %v2073_v56 = vpop.eup %2072 }
 0x12b   :  { %v581_v57 = vadd.f32 1.0, %v2073_v56 }
 0x12c   :  { %v2075_v58 = vpop.eup %2074 }
 0x12d   :  { %2080 = vrcp.f32 %v581_v57  ;;  %v582_v59 = vadd.f32 1.0, %v2075_v58  ;;  %v2077_v60 = vpop.eup %2076 }
 0x12e   :  { %v2079_v61 = vpop.eup %2078  ;;  %v583_v17 = vadd.f32 1.0, %v2077_v60 }
 0x12f   :  { %2082 = vrcp.f32 %v582_v59  ;;  %s277_s27 = sshra.s32 %s1873_s23, 3 }
 0x130   :  { %2084 = vrcp.f32 %v583_v17  ;;  %v609_v17 = vld [vmem:[#allocation2 + $0x10] sm:$0xc] }
 0x13a   :  { %v2081_v62 = vpop.eup %2080 }
 0x13b   :  { %v592_v31 = vmul.f32 %v2081_v62, %v2079_v61 }
 0x13c   :  { %v2083_v63 = vpop.eup %2082 }
 0x13d   :  { %v591_v28 = vmul.f32 0.0, %v2083_v63  ;;  %v2085_v38 = vpop.eup %2084 }
 0x13f   :  { %v2535_v37 = vadd.f32 %v592_v31, %v591_v28 }
 0x141   :  { %2086 = vtanh.f32 %v2535_v37 }
 0x14e   :  { %v2087_v39 = vpop.eup %2086 }
 0x14f   :  { %v2543_v41 = vmul.f32 %v2087_v39, %v2085_v38  ;;  %v610_v38 = vld [vmem:[#allocation2 + $0x18] sm:$0xc] }
 0x151   :  { %v611_v42 = vpack.c.bf16 %v2543_v41, %v2543_v41  ;;  %v602_v43 = vmul.f32 %v2541_v40, %v2543_v41 }
 0x153   :  { %645 = vmatmul.mubr.bf16.vlgmr.msra.gmra.mxu0 %v611_v42  ;;  %686 = vmatmul.mubr.bf16.vlgmr.msra.gmra.mxu1 %v611_v42  ;;  %v604_v44 = vsel %vm603_vm1, %v602_v43, 0.0 }
 0x154   :  { %605 = vadd.xlane.f32.xlu1 %v604_v44  ;;  %751 = vmatpush1.bf16.msra.mxu0 %v2384_v1 }
 0x155   :  { %792 = vmatpush1.bf16.msra.mxu1 %v2404_v7  ;;  %752 = vmatprep.subr.bf16.mxu0 %v2391_v3 }
 0x156   :  { %793 = vmatprep.subr.bf16.mxu1 %v2414_v10  ;;  %782 = vmatprep.mubr.bf16.mxu0 %v2325_v2 }
 0x157   :  { %823 = vmatprep.mubr.bf16.mxu1 %v2325_v2 }
 0x158   :  { %753 = vmatpush1.bf16.msra.mxu0 %v2395_v4 }
 0x159   :  { %794 = vmatpush1.bf16.msra.mxu1 %v2416_v11  ;;  %754 = vmatprep.subr.bf16.mxu0 %v2398_v5 }
 0x15a   :  { %795 = vmatprep.subr.bf16.mxu1 %v2426_v14 }
 0x15c   :  { %755 = vmatpush1.bf16.msra.mxu0 %v2407_v8 }
 0x15d   :  { %796 = vmatpush1.bf16.msra.mxu1 %v2430_v15  ;;  %756 = vmatprep.subr.bf16.mxu0 %v2411_v9 }
 0x15e   :  { %797 = vmatprep.subr.bf16.mxu1 %v2434_v16 }
 0x160   :  { %757 = vmatpush1.bf16.msra.mxu0 %v2422_v12 }
 0x161   :  { %798 = vmatpush1.bf16.msra.mxu1 %v2444_v20  ;;  %758 = vmatprep.subr.bf16.mxu0 %v2424_v13 }
 0x162   :  { %799 = vmatprep.subr.bf16.mxu1 %v2447_v21 }
 0x164   :  { %759 = vmatpush1.bf16.msra.mxu0 %v2438_v18 }
 0x165   :  { %800 = vmatpush1.bf16.msra.mxu1 %v2460_v25  ;;  %760 = vmatprep.subr.bf16.mxu0 %v2441_v19 }
 0x166   :  { %801 = vmatprep.subr.bf16.mxu1 %v2465_v27 }
 0x168   :  { %761 = vmatpush1.bf16.msra.mxu0 %v2454_v23 }
 0x169   :  { %802 = vmatpush1.bf16.msra.mxu1 %v2469_v30  ;;  %762 = vmatprep.subr.bf16.mxu0 %v2456_v24 }
 0x16a   :  { %803 = vmatprep.subr.bf16.mxu1 %v2474_v32 }
 0x16c   :  { %763 = vmatpush1.bf16.msra.mxu0 %v2462_v26 }
 0x16d   :  { %804 = vmatpush1.bf16.msra.mxu1 %v2486_v34  ;;  %764 = vmatprep.subr.bf16.mxu0 %v2467_v29 }
 0x16e   :  { %805 = vmatprep.subr.bf16.mxu1 %v2489_v35 }
 0x170   :  { %765 = vmatpush1.bf16.msra.mxu0 %v2480_v33 }
 0x171   :  { %806 = vmatpush1.bf16.msra.mxu1 %v2493_v36  ;;  %888 = vmatprep.subr.bf16.mxu0 %v2382_v0 }
 0x172   :  { %929 = vmatprep.subr.bf16.mxu1 %v2402_v6 }
 0x213   :  { %v646_v48 = vpop.f32.mrf.mxu0  ;;  %v687_v49 = vpop.f32.mrf.mxu1 }
 0x214   :  { %v698_v50 = vrot.slane %v646_v48, 6  ;;  %v700_v63 = vrot.slane %v687_v49, 6 }
 0x215   :  { %v648_v52 = vpop.f32.mrf.mxu0  ;;  %v689_v53 = vpop.f32.mrf.mxu1 }
 0x216   :  { %v706_v54 = vadd.f32 %v698_v50, %v607_v47  ;;  %v699_v55 = vrot.slane %v648_v52, 6  ;;  %v708_v28 = vadd.f32 %v700_v63, %v609_v17  ;;  %v701_v31 = vrot.slane %v689_v53, 6  ;;  %v155_v63 = vld [vmem:[%s154_s28] ss:$8 sm:$0xf]  ;;  %s215_s28 = sand.u32 7, %s1858_s25 }
 0x217   :  { %v650_v56 = vpop.f32.mrf.mxu0  ;;  %v691_v57 = vpop.f32.mrf.mxu1  ;;  %157 = vst.msk [vmem:[#allocation2 + $0x5] ss:$8 sm:$0xf] %vm2449_vm0, %v155_v63  ;;  %s218_s7 = sadd.s32 %s1952_s29, %s215_s28  ;;  %s280_s29 = sand.u32 7, %s1873_s23 }
 0x218   :  { %v1912_v58 = vmul.f32 -1.442695, %v706_v54  ;;  %v707_v59 = vadd.f32 %v699_v55, %v608_v51  ;;  %v1914_v39 = vmul.f32 -1.442695, %v708_v28  ;;  %v709_v43 = vadd.f32 %v701_v31, %v610_v38  ;;  %s219_s9 = scalar_lea.vmem [#allocation6], %s218_s7 }
 0x219   :  { %v651_v60 = vpop.f32.mrf.mxu0  ;;  %v692_v61 = vpop.f32.mrf.mxu1  ;;  %v730_v51 = vrot.slane %v2535_v37, 6 }
 0x21a   :  { %2088 = vpow2.f32 %v1912_v58  ;;  %v1913_v62 = vmul.f32 -1.442695, %v707_v59 }
 0x21c   :  { %2090 = vpow2.f32 %v1913_v62  ;;  %v142_v62 = vld [vmem:[%s141_s26] ss:$8 sm:$0xf]  ;;  %s1861_s26 = sld [smem:[#allocation3 + $0xb]] }
 0x21d   :  { %2092 = vpow2.f32 %v1914_v39  ;;  %144 = vst.msk [vmem:[#allocation2 + $0x4] ss:$8 sm:$0xf] %vm2449_vm0, %v142_v62 }
 0x222   :  { %s225_s30 = sshra.s32 %s1861_s26, 3  ;;  %s228_s0 = sand.u32 7, %s1861_s26 }
 0x223   :  { %s1953_s8 = sshll.u32 %s225_s30, 5  ;;  %s1957_s30 = sshll.u32 %s277_s27, 5 }
 0x224   :  { %v742_v17 = vld [vmem:[#allocation2] sm:$0x30]  ;;  %v743_v39 = vld [vmem:[#allocation2 + $0x8] sm:$0x30]  ;;  %s231_s10 = sadd.s32 %s1953_s8, %s228_s0  ;;  %s283_s0 = sadd.s32 %s1957_s30, %s280_s29 }
 0x225   :  { %s232_s2 = scalar_lea.vmem [#allocation6], %s231_s10  ;;  %s284_s8 = scalar_lea.vmem [#allocation6], %s283_s0 }
 0x227   :  { %v2089_v42 = vpop.eup %2088 }
 0x228   :  { %v719_v44 = vadd.f32 1.0, %v2089_v42 }
 0x229   :  { %v2091_v45 = vpop.eup %2090 }
 0x22a   :  { %2094 = vrcp.f32 %v719_v44  ;;  %v720_v46 = vadd.f32 1.0, %v2091_v45  ;;  %v2093_v47 = vpop.eup %2092 }
 0x22b   :  { %2096 = vtanh.f32 %v709_v43  ;;  %v721_v52 = vadd.f32 1.0, %v2093_v47 }
 0x22c   :  { %2098 = vrcp.f32 %v720_v46 }
 0x22d   :  { %2100 = vrcp.f32 %v721_v52 }
 0x237   :  { %v2095_v48 = vpop.eup %2094 }
 0x238   :  { %v2097_v50 = vpop.eup %2096 }
 0x239   :  { %v2099_v49 = vpop.eup %2098  ;;  %v733_v53 = vmul.f32 %v2097_v50, %v2095_v48 }
 0x23a   :  { %v732_v54 = vmul.f32 %v2099_v49, %v730_v51  ;;  %v2101_v56 = vpop.eup %2100 }
 0x23c   :  { %v2589_v55 = vadd.f32 %v733_v53, %v732_v54  ;;  %v744_v53 = vld [vmem:[#allocation2 + $0x10] sm:$0x30] }
 0x23e   :  { %2102 = vtanh.f32 %v2589_v55 }
 0x24b   :  { %v2103_v57 = vpop.eup %2102 }
 0x24c   :  { %v2592_v58 = vmul.f32 %v2103_v57, %v2101_v56 }
 0x24e   :  { %v737_v59 = vmul.f32 %v2541_v40, %v2592_v58  ;;  %v746_v37 = vpack.c.bf16 %v2592_v58, %v2592_v58 }
 0x250   :  { %v739_v60 = vsel %vm738_vm2, %v737_v59, 0.0  ;;  %v748_v61 = vrot.slane %v746_v37, 1  ;;  %v745_v59 = vld [vmem:[#allocation2 + $0x18] sm:$0x30] }
 0x251   :  { %740 = vadd.xlane.f32.xlu0 %v739_v60 }
 0x252   :  { %783 = vmatmul.mubr.bf16.vlgmr.msra.gmra.mxu0 %v748_v61  ;;  %824 = vmatmul.mubr.bf16.vlgmr.msra.gmra.mxu1 %v748_v61 }
 0x253   :  { %889 = vmatpush1.bf16.msra.mxu0 %v2384_v1  ;;  %930 = vmatpush1.bf16.msra.mxu1 %v2404_v7 }
 0x254   :  { %890 = vmatprep.subr.bf16.mxu0 %v2391_v3  ;;  %931 = vmatprep.subr.bf16.mxu1 %v2414_v10 }
 0x255   :  { %920 = vmatprep.mubr.bf16.mxu0 %v2325_v2  ;;  %961 = vmatprep.mubr.bf16.mxu1 %v2325_v2 }
 0x257   :  { %891 = vmatpush1.bf16.msra.mxu0 %v2395_v4  ;;  %932 = vmatpush1.bf16.msra.mxu1 %v2416_v11 }
 0x258   :  { %892 = vmatprep.subr.bf16.mxu0 %v2398_v5  ;;  %933 = vmatprep.subr.bf16.mxu1 %v2426_v14 }
 0x25b   :  { %893 = vmatpush1.bf16.msra.mxu0 %v2407_v8  ;;  %934 = vmatpush1.bf16.msra.mxu1 %v2430_v15 }
 0x25c   :  { %894 = vmatprep.subr.bf16.mxu0 %v2411_v9  ;;  %935 = vmatprep.subr.bf16.mxu1 %v2434_v16 }
 0x25f   :  { %895 = vmatpush1.bf16.msra.mxu0 %v2422_v12  ;;  %936 = vmatpush1.bf16.msra.mxu1 %v2444_v20 }
 0x260   :  { %896 = vmatprep.subr.bf16.mxu0 %v2424_v13  ;;  %937 = vmatprep.subr.bf16.mxu1 %v2447_v21 }
 0x263   :  { %897 = vmatpush1.bf16.msra.mxu0 %v2438_v18  ;;  %938 = vmatpush1.bf16.msra.mxu1 %v2460_v25 }
 0x264   :  { %898 = vmatprep.subr.bf16.mxu0 %v2441_v19  ;;  %939 = vmatprep.subr.bf16.mxu1 %v2465_v27 }
 0x267   :  { %899 = vmatpush1.bf16.msra.mxu0 %v2454_v23  ;;  %940 = vmatpush1.bf16.msra.mxu1 %v2469_v30 }
 0x268   :  { %900 = vmatprep.subr.bf16.mxu0 %v2456_v24  ;;  %941 = vmatprep.subr.bf16.mxu1 %v2474_v32 }
 0x26b   :  { %901 = vmatpush1.bf16.msra.mxu0 %v2462_v26  ;;  %942 = vmatpush1.bf16.msra.mxu1 %v2486_v34 }
 0x26c   :  { %902 = vmatprep.subr.bf16.mxu0 %v2467_v29  ;;  %943 = vmatprep.subr.bf16.mxu1 %v2489_v35 }
 0x26f   :  { %903 = vmatpush1.bf16.msra.mxu0 %v2480_v33  ;;  %944 = vmatpush1.bf16.msra.mxu1 %v2493_v36 }
 0x270   :  { %1026 = vmatprep.subr.bf16.mxu0 %v2382_v0  ;;  %1067 = vmatprep.subr.bf16.mxu1 %v2402_v6 }
 0x312   :  { %v784_v28 = vpop.f32.mrf.mxu0  ;;  %v825_v31 = vpop.f32.mrf.mxu1 }
 0x313   :  { %v836_v38 = vrot.slane %v784_v28, 4  ;;  %v838_v54 = vrot.slane %v825_v31, 4 }
 0x314   :  { %v786_v42 = vpop.f32.mrf.mxu0  ;;  %v827_v43 = vpop.f32.mrf.mxu1 }
 0x315   :  { %v844_v44 = vadd.f32 %v836_v38, %v742_v17  ;;  %v837_v45 = vrot.slane %v786_v42, 4  ;;  %v846_v56 = vadd.f32 %v838_v54, %v744_v53  ;;  %v839_v57 = vrot.slane %v827_v43, 4 }
 0x316   :  { %v788_v46 = vpop.f32.mrf.mxu0  ;;  %v829_v47 = vpop.f32.mrf.mxu1  ;;  %v868_v42 = vrot.slane %v2589_v55, 6 }
 0x317   :  { %v1915_v48 = vmul.f32 -1.442695, %v844_v44  ;;  %v845_v50 = vadd.f32 %v837_v45, %v743_v39  ;;  %v1917_v37 = vmul.f32 -1.442695, %v846_v56  ;;  %v847_v61 = vadd.f32 %v839_v57, %v745_v59 }
 0x318   :  { %v789_v51 = vpop.f32.mrf.mxu0  ;;  %v830_v49 = vpop.f32.mrf.mxu1 }
 0x319   :  { %2104 = vpow2.f32 %v1915_v48  ;;  %v1916_v52 = vmul.f32 -1.442695, %v845_v50 }
 0x31b   :  { %2106 = vpow2.f32 %v1916_v52 }
 0x31c   :  { %2108 = vpow2.f32 %v1917_v37 }
 0x326   :  { %v2105_v60 = vpop.eup %2104 }
 0x327   :  { %v857_v62 = vadd.f32 1.0, %v2105_v60 }
 0x328   :  { %v2107_v63 = vpop.eup %2106 }
 0x329   :  { %2110 = vrcp.f32 %v857_v62  ;;  %v858_v17 = vadd.f32 1.0, %v2107_v63  ;;  %v2109_v28 = vpop.eup %2108 }
 0x32a   :  { %2112 = vtanh.f32 %v847_v61  ;;  %v859_v44 = vadd.f32 1.0, %v2109_v28 }
 0x32b   :  { %2114 = vrcp.f32 %v858_v17 }
 0x32c   :  { %2116 = vrcp.f32 %v859_v44 }
 0x336   :  { %v2111_v38 = vpop.eup %2110 }
 0x337   :  { %v2113_v39 = vpop.eup %2112 }
 0x338   :  { %v2115_v31 = vpop.eup %2114  ;;  %v871_v43 = vmul.f32 %v2113_v39, %v2111_v38 }
 0x339   :  { %v870_v45 = vmul.f32 %v2115_v31, %v868_v42  ;;  %v2117_v47 = vpop.eup %2116 }
 0x33b   :  { %v2638_v46 = vadd.f32 %v871_v43, %v870_v45 }
 0x33d   :  { %2118 = vtanh.f32 %v2638_v46 }
 0x34a   :  { %v2119_v48 = vpop.eup %2118 }
 0x34b   :  { %v2641_v50 = vmul.f32 %v2119_v48, %v2117_v47 }
 0x34d   :  { %v875_v51 = vmul.f32 %v2541_v40, %v2641_v50  ;;  %v884_v55 = vpack.c.bf16 %v2641_v50, %v2641_v50 }
 0x34f   :  { %v877_v49 = vsel %vm876_vm3, %v875_v51, 0.0  ;;  %v886_v52 = vrot.slane %v884_v55, 2 }
 0x350   :  { %878 = vadd.xlane.f32.xlu0 %v877_v49  ;;  %v1006_v49 = vrot.slane %v2638_v46, 6 }
 0x351   :  { %921 = vmatmul.mubr.bf16.vlgmr.msra.gmra.mxu0 %v886_v52  ;;  %962 = vmatmul.mubr.bf16.vlgmr.msra.gmra.mxu1 %v886_v52 }
 0x352   :  { %1027 = vmatpush1.bf16.msra.mxu0 %v2384_v1  ;;  %1068 = vmatpush1.bf16.msra.mxu1 %v2404_v7  ;;  %v168_v1 = vld [vmem:[%s167_s12] ss:$8 sm:$0xf] }
 0x353   :  { %1028 = vmatprep.subr.bf16.mxu0 %v2391_v3  ;;  %1069 = vmatprep.subr.bf16.mxu1 %v2414_v10  ;;  %170 = vst.msk [vmem:[#allocation2 + $0x6] ss:$8 sm:$0xf] %vm2449_vm0, %v168_v1  ;;  %v181_v3 = vld [vmem:[%s180_s14] ss:$8 sm:$0xf] }
 0x354   :  { %1058 = vmatprep.mubr.bf16.mxu0 %v2325_v2  ;;  %1099 = vmatprep.mubr.bf16.mxu1 %v2325_v2  ;;  %183 = vst.msk [vmem:[#allocation2 + $0x7] ss:$8 sm:$0xf] %vm2449_vm0, %v181_v3 }
 0x356   :  { %1029 = vmatpush1.bf16.msra.mxu0 %v2395_v4  ;;  %1070 = vmatpush1.bf16.msra.mxu1 %v2416_v11 }
 0x357   :  { %1030 = vmatprep.subr.bf16.mxu0 %v2398_v5  ;;  %1071 = vmatprep.subr.bf16.mxu1 %v2426_v14 }
 0x35a   :  { %1031 = vmatpush1.bf16.msra.mxu0 %v2407_v8  ;;  %1072 = vmatpush1.bf16.msra.mxu1 %v2430_v15 }
 0x35b   :  { %1032 = vmatprep.subr.bf16.mxu0 %v2411_v9  ;;  %1073 = vmatprep.subr.bf16.mxu1 %v2434_v16  ;;  %v880_v4 = vld [vmem:[#allocation2] sm:$0xc0]  ;;  %v881_v9 = vld [vmem:[#allocation2 + $0x8] sm:$0xc0]  ;;  %v883_v39 = vld [vmem:[#allocation2 + $0x18] sm:$0xc0] }
 0x35e   :  { %1033 = vmatpush1.bf16.msra.mxu0 %v2422_v12  ;;  %1074 = vmatpush1.bf16.msra.mxu1 %v2444_v20 }
 0x35f   :  { %1034 = vmatprep.subr.bf16.mxu0 %v2424_v13  ;;  %1075 = vmatprep.subr.bf16.mxu1 %v2447_v21 }
 0x362   :  { %1035 = vmatpush1.bf16.msra.mxu0 %v2438_v18  ;;  %1076 = vmatpush1.bf16.msra.mxu1 %v2460_v25 }
 0x363   :  { %1036 = vmatprep.subr.bf16.mxu0 %v2441_v19  ;;  %1077 = vmatprep.subr.bf16.mxu1 %v2465_v27 }
 0x366   :  { %1037 = vmatpush1.bf16.msra.mxu0 %v2454_v23  ;;  %1078 = vmatpush1.bf16.msra.mxu1 %v2469_v30 }
 0x367   :  { %1038 = vmatprep.subr.bf16.mxu0 %v2456_v24  ;;  %1079 = vmatprep.subr.bf16.mxu1 %v2474_v32 }
 0x36a   :  { %1039 = vmatpush1.bf16.msra.mxu0 %v2462_v26  ;;  %1080 = vmatpush1.bf16.msra.mxu1 %v2486_v34 }
 0x36b   :  { %1040 = vmatprep.subr.bf16.mxu0 %v2467_v29  ;;  %1081 = vmatprep.subr.bf16.mxu1 %v2489_v35 }
 0x36e   :  { %1041 = vmatpush1.bf16.msra.mxu0 %v2480_v33  ;;  %1082 = vmatpush1.bf16.msra.mxu1 %v2493_v36 }
 0x36f   :  { %1148 = vmatprep.subr.bf16.mxu0 %v2382_v0  ;;  %1189 = vmatprep.subr.bf16.mxu1 %v2402_v6  ;;  %v882_v6 = vld [vmem:[#allocation2 + $0x10] sm:$0xc0] }
 0x411   :  { %v922_v5 = vpop.f32.mrf.mxu0  ;;  %v963_v7 = vpop.f32.mrf.mxu1 }
 0x412   :  { %v974_v8 = vrot.slane %v922_v5, 2  ;;  %v976_v0 = vrot.slane %v963_v7, 2 }
 0x413   :  { %v924_v54 = vpop.f32.mrf.mxu0  ;;  %v965_v53 = vpop.f32.mrf.mxu1 }
 0x414   :  { %v982_v56 = vadd.f32 %v974_v8, %v880_v4  ;;  %v975_v57 = vrot.slane %v924_v54, 2  ;;  %v984_v28 = vadd.f32 %v976_v0, %v882_v6  ;;  %v977_v38 = vrot.slane %v965_v53, 2 }
 0x415   :  { %v926_v59 = vpop.f32.mrf.mxu0  ;;  %v967_v37 = vpop.f32.mrf.mxu1 }
 0x416   :  { %v1918_v60 = vmul.f32 -1.442695, %v982_v56  ;;  %v983_v61 = vadd.f32 %v975_v57, %v881_v9  ;;  %v1920_v42 = vmul.f32 -1.442695, %v984_v28  ;;  %v985_v44 = vadd.f32 %v977_v38, %v883_v39  ;;  %v2697_v57 = vld [vmem:[#allocation7 + $0xe0] ss:$16 sps:$4 sm:$0xff]  }
 0x417   :  { %v927_v62 = vpop.f32.mrf.mxu0  ;;  %v968_v63 = vpop.f32.mrf.mxu1  ;;  %v2700_v59 = vld [vmem:[#allocation7 + $0xe8] ss:$16 sps:$4 sm:$0xff]   ;;  %v2703_v37 = vld [vmem:[#allocation7 + $0xc4] ss:$16 sps:$4 sm:$0xff]  }
 0x418   :  { %2120 = vpow2.f32 %v1918_v60  ;;  %v1919_v17 = vmul.f32 -1.442695, %v983_v61  ;;  %v2709_v60 = vld [vmem:[#allocation7 + $0xc0] ss:$16 sps:$4 sm:$0xff]   ;;  %v2713_v61 = vld [vmem:[#allocation7 + $0xa4] ss:$16 sps:$4 sm:$0xff]  }
 0x419   :  { %v2717_v62 = vld [vmem:[#allocation7 + $0xa0] ss:$16 sps:$4 sm:$0xff]  }
 0x41a   :  { %2122 = vpow2.f32 %v1919_v17 }
 0x41b   :  { %2124 = vpow2.f32 %v1920_v42 }
 0x425   :  { %v2121_v31 = vpop.eup %2120 }
 0x426   :  { %v995_v45 = vadd.f32 1.0, %v2121_v31 }
 0x427   :  { %v2123_v43 = vpop.eup %2122 }
 0x428   :  { %2126 = vrcp.f32 %v995_v45  ;;  %v996_v47 = vadd.f32 1.0, %v2123_v43  ;;  %v2125_v48 = vpop.eup %2124 }
 0x429   :  { %2128 = vtanh.f32 %v985_v44  ;;  %v997_v1 = vadd.f32 1.0, %v2125_v48 }
 0x42a   :  { %2130 = vrcp.f32 %v996_v47 }
 0x42b   :  { %2132 = vrcp.f32 %v997_v1 }
 0x435   :  { %v2127_v51 = vpop.eup %2126 }
 0x436   :  { %v2129_v55 = vpop.eup %2128 }
 0x437   :  { %v2131_v52 = vpop.eup %2130  ;;  %v1009_v4 = vmul.f32 %v2129_v55, %v2127_v51 }
 0x438   :  { %v1008_v3 = vmul.f32 %v2131_v52, %v1006_v49  ;;  %v2133_v7 = vpop.eup %2132 }
 0x43a   :  { %v2687_v5 = vadd.f32 %v1009_v4, %v1008_v3  ;;  %v2767_v4 = vld [vmem:[#allocation7 + $0xcc] ss:$16 sps:$4 sm:$0xff]  }
 0x43c   :  { %2134 = vtanh.f32 %v2687_v5  ;;  %v1132_v31 = vrot.slane %v2687_v5, 6  ;;  %v2777_v5 = vld [vmem:[#allocation7 + $0xac] ss:$16 sps:$4 sm:$0xff]  }
 0x449   :  { %v2135_v8 = vpop.eup %2134 }
 0x44a   :  { %v2690_v9 = vmul.f32 %v2135_v8, %v2133_v7  ;;  %v2781_v7 = vld [vmem:[#allocation7 + $0xa8] ss:$16 sps:$4 sm:$0xff]   ;;  %v2785_v8 = vld [vmem:[#allocation7 + $0x8c] ss:$16 sps:$4 sm:$0xff]  }
 0x44c   :  { %v1013_v54 = vmul.f32 %v2541_v40, %v2690_v9  ;;  %v1022_v46 = vpack.c.bf16 %v2690_v9, %v2690_v9 }
 0x44e   :  { %v1015_v53 = vsel %vm1014_vm4, %v1013_v54, 0.0  ;;  %v1024_v56 = vrot.slane %v1022_v46, 3  ;;  %v2788_v54 = vld [vmem:[#allocation7 + $0x80] ss:$16 sps:$4 sm:$0xff]   ;;  %v2791_v46 = vld [vmem:[#allocation7 + $0x88] ss:$16 sps:$4 sm:$0xff]  }
 0x44f   :  { %1016 = vadd.xlane.f32.xlu1 %v1015_v53  ;;  %v2794_v53 = vld [vmem:[#allocation7 + $0x64] ss:$16 sps:$4 sm:$0xff]  }
 0x450   :  { %1059 = vmatmul.mubr.bf16.vlgmr.msra.gmra.mxu0 %v1024_v56  ;;  %1100 = vmatmul.mubr.bf16.vlgmr.msra.gmra.mxu1 %v1024_v56  ;;  %v2797_v56 = vld [vmem:[#allocation7 + $0x6c] ss:$16 sps:$4 sm:$0xff]  }
 0x451   :  { %1149 = vmatpush1.bf16.msra.mxu0 %v2697_v57  ;;  %1190 = vmatpush1.bf16.msra.mxu1 %v2700_v59 }
 0x452   :  { %1150 = vmatprep.subr.bf16.mxu0 %v2703_v37  ;;  %1191 = vmatprep.subr.bf16.mxu1 %v2414_v10  ;;  %v2721_v10 = vld [vmem:[#allocation7 + $0x84] ss:$16 sps:$4 sm:$0xff]  }
 0x453   :  { %1180 = vmatprep.mubr.bf16.mxu0 %v2325_v2  ;;  %1221 = vmatprep.mubr.bf16.mxu1 %v2325_v2 }
 0x455   :  { %1151 = vmatpush1.bf16.msra.mxu0 %v2709_v60  ;;  %1192 = vmatpush1.bf16.msra.mxu1 %v2416_v11  ;;  %v194_v11 = vld [vmem:[%s193_s22] ss:$8 sm:$0xf]  ;;  %s1870_s22 = sld [smem:[#allocation3 + $0xe]] }
 0x456   :  { %1152 = vmatprep.subr.bf16.mxu0 %v2713_v61  ;;  %1193 = vmatprep.subr.bf16.mxu1 %v2426_v14  ;;  %196 = vst.msk [vmem:[#allocation2 + $0x20] ss:$8 sm:$0xf] %vm2449_vm0, %v194_v11  ;;  %v2750_v14 = vld [vmem:[#allocation7 + $0xec] ss:$16 sps:$4 sm:$0xff]  }
 0x457   :  { %v2800_v11 = vld [vmem:[#allocation7 + $0x60] ss:$16 sps:$4 sm:$0xff]  }
 0x459   :  { %1153 = vmatpush1.bf16.msra.mxu0 %v2717_v62  ;;  %1194 = vmatpush1.bf16.msra.mxu1 %v2430_v15 }
 0x45a   :  { %1154 = vmatprep.subr.bf16.mxu0 %v2721_v10  ;;  %1195 = vmatprep.subr.bf16.mxu1 %v2434_v16 }
 0x45b   :  { %s267_s25 = sand.u32 7, %s1870_s22 }
 0x45d   :  { %1155 = vmatpush1.bf16.msra.mxu0 %v2422_v12  ;;  %1196 = vmatpush1.bf16.msra.mxu1 %v2444_v20  ;;  %v207_v12 = vld [vmem:[%s206_s24] ss:$8 sm:$0xf]  ;;  %s264_s24 = sshra.s32 %s1870_s22, 3 }
 0x45e   :  { %1156 = vmatprep.subr.bf16.mxu0 %v2424_v13  ;;  %1197 = vmatprep.subr.bf16.mxu1 %v2447_v21  ;;  %209 = vst.msk [vmem:[#allocation2 + $0x21] ss:$8 sm:$0xf] %vm2449_vm0, %v207_v12  ;;  %v2747_v13 = vld [vmem:[#allocation7 + $0xe4] ss:$16 sps:$4 sm:$0xff]   ;;  %s1956_s26 = sshll.u32 %s264_s24, 5 }
 0x45f   :  { %v2803_v12 = vld [vmem:[#allocation7 + $0x68] ss:$16 sps:$4 sm:$0xff]   ;;  %s270_s28 = sadd.s32 %s1956_s26, %s267_s25 }
 0x460   :  { %s271_s7 = scalar_lea.vmem [#allocation6], %s270_s28 }
 0x461   :  { %1157 = vmatpush1.bf16.msra.mxu0 %v2438_v18  ;;  %1198 = vmatpush1.bf16.msra.mxu1 %v2460_v25 }
 0x462   :  { %1158 = vmatprep.subr.bf16.mxu0 %v2441_v19  ;;  %1199 = vmatprep.subr.bf16.mxu1 %v2465_v27 }
 0x465   :  { %1159 = vmatpush1.bf16.msra.mxu0 %v2454_v23  ;;  %1200 = vmatpush1.bf16.msra.mxu1 %v2469_v30  ;;  %v1018_v15 = vld [vmem:[#allocation2 + $0x20] sm:$0x3]  ;;  %v1019_v19 = vld [vmem:[#allocation2 + $0x28] sm:$0x3] }
 0x466   :  { %1160 = vmatprep.subr.bf16.mxu0 %v2456_v24  ;;  %1201 = vmatprep.subr.bf16.mxu1 %v2474_v32 }
 0x469   :  { %1161 = vmatpush1.bf16.msra.mxu0 %v2462_v26  ;;  %1202 = vmatpush1.bf16.msra.mxu1 %v2486_v34 }
 0x46a   :  { %1162 = vmatprep.subr.bf16.mxu0 %v2467_v29  ;;  %1203 = vmatprep.subr.bf16.mxu1 %v2489_v35  ;;  %v1021_v35 = vld [vmem:[#allocation2 + $0x38] sm:$0x3] }
 0x46d   :  { %1163 = vmatpush1.bf16.msra.mxu0 %v2480_v33  ;;  %1204 = vmatpush1.bf16.msra.mxu1 %v2493_v36  ;;  %v1020_v33 = vld [vmem:[#allocation2 + $0x30] sm:$0x3] }
 0x46e   :  { %1285 = vmatprep.subr.bf16.mxu0 %v2747_v13  ;;  %1326 = vmatprep.subr.bf16.mxu1 %v2750_v14 }
 0x510   :  { %v1060_v16 = vpop.f32.mrf.mxu0  ;;  %v1101_v18 = vpop.f32.mrf.mxu1 }
 0x511   :  { %v1108_v20 = vadd.f32 %v1060_v16, %v1018_v15  ;;  %v1110_v34 = vadd.f32 %v1101_v18, %v1020_v33  ;;  %v2806_v15 = vld [vmem:[#allocation7 + $0x44] ss:$16 sps:$4 sm:$0xff]   ;;  %v2809_v16 = vld [vmem:[#allocation7 + $0x4c] ss:$16 sps:$4 sm:$0xff]  }
 0x512   :  { %v1062_v21 = vpop.f32.mrf.mxu0  ;;  %v1103_v23 = vpop.f32.mrf.mxu1  ;;  %v220_v18 = vld [vmem:[%s219_s9] ss:$8 sm:$0xf] }
 0x513   :  { %v1921_v24 = vmul.f32 -1.442695, %v1108_v20  ;;  %v1109_v25 = vadd.f32 %v1062_v21, %v1019_v19  ;;  %v1923_v36 = vmul.f32 -1.442695, %v1110_v34  ;;  %v1111_v17 = vadd.f32 %v1103_v23, %v1021_v35  ;;  %v2812_v19 = vld [vmem:[#allocation7 + $0x40] ss:$16 sps:$4 sm:$0xff]  }
 0x514   :  { %v1064_v26 = vpop.f32.mrf.mxu0  ;;  %v1105_v27 = vpop.f32.mrf.mxu1  ;;  %222 = vst.msk [vmem:[#allocation2 + $0x22] ss:$8 sm:$0xf] %vm2449_vm0, %v220_v18  ;;  %v2817_v20 = vld [vmem:[#allocation7 + $0x48] ss:$16 sps:$4 sm:$0xff]  }
 0x515   :  { %2136 = vpow2.f32 %v1921_v24  ;;  %v1922_v29 = vmul.f32 -1.442695, %v1109_v25  ;;  %v2820_v21 = vld [vmem:[#allocation7 + $0x24] ss:$16 sps:$4 sm:$0xff]   ;;  %v2823_v24 = vld [vmem:[#allocation7 + $0x2c] ss:$16 sps:$4 sm:$0xff]  }
 0x516   :  { %v1065_v30 = vpop.f32.mrf.mxu0  ;;  %v1106_v32 = vpop.f32.mrf.mxu1  ;;  %v233_v23 = vld [vmem:[%s232_s2] ss:$8 sm:$0xf]  ;;  %v2834_v27 = vld [vmem:[#allocation7 + $0x4] ss:$16 sps:$4 sm:$0xff]  }
 0x517   :  { %2138 = vpow2.f32 %v1922_v29  ;;  %235 = vst.msk [vmem:[#allocation2 + $0x23] ss:$8 sm:$0xf] %vm2449_vm0, %v233_v23  ;;  %v2828_v25 = vld [vmem:[#allocation7 + $0x20] ss:$16 sps:$4 sm:$0xff]  }
 0x518   :  { %2140 = vpow2.f32 %v1923_v36  ;;  %v2831_v26 = vld [vmem:[#allocation7 + $0x28] ss:$16 sps:$4 sm:$0xff]   ;;  %v2837_v29 = vld [vmem:[#allocation7 + $0xc] ss:$16 sps:$4 sm:$0xff]   ;;  %v2840_v30 = vld [vmem:[#allocation7] ss:$16 sps:$4 sm:$0xff]  }
 0x519   :  { %v2843_v32 = vld [vmem:[#allocation7 + $0x8] ss:$16 sps:$4 sm:$0xff]  }
 0x51e   :  { %v1143_v33 = vld [vmem:[#allocation2 + $0x20] sm:$0xc] }
 0x522   :  { %v2137_v63 = vpop.eup %2136 }
 0x523   :  { %v1121_v0 = vadd.f32 1.0, %v2137_v63  ;;  %v1144_v63 = vld [vmem:[#allocation2 + $0x28] sm:$0xc] }
 0x524   :  { %v2139_v6 = vpop.eup %2138 }
 0x525   :  { %2142 = vrcp.f32 %v1121_v0  ;;  %v1122_v28 = vadd.f32 1.0, %v2139_v6  ;;  %v2141_v38 = vpop.eup %2140 }
 0x526   :  { %2144 = vtanh.f32 %v1111_v17  ;;  %v1123_v45 = vadd.f32 1.0, %v2141_v38 }
 0x527   :  { %2146 = vrcp.f32 %v1122_v28 }
 0x528   :  { %2148 = vrcp.f32 %v1123_v45 }
 0x532   :  { %v2143_v39 = vpop.eup %2142 }
 0x533   :  { %v2145_v42 = vpop.eup %2144 }
 0x534   :  { %v2147_v44 = vpop.eup %2146  ;;  %v1135_v47 = vmul.f32 %v2145_v42, %v2143_v39 }
 0x535   :  { %v1134_v43 = vmul.f32 %v2147_v44, %v1132_v31  ;;  %v2149_v51 = vpop.eup %2148 }
 0x537   :  { %v2754_v48 = vadd.f32 %v1135_v47, %v1134_v43 }
 0x539   :  { %2150 = vtanh.f32 %v2754_v48 }
 0x546   :  { %v2151_v55 = vpop.eup %2150 }
 0x547   :  { %v2757_v49 = vmul.f32 %v2151_v55, %v2149_v51  ;;  %v1146_v55 = vld [vmem:[#allocation2 + $0x38] sm:$0xc] }
 0x549   :  { %v1147_v52 = vpack.c.bf16 %v2757_v49, %v2757_v49  ;;  %v1139_v1 = vmul.f32 %v2541_v40, %v2757_v49  ;;  %v2773_v40 = vld [vmem:[#allocation7 + $0xc8] ss:$16 sps:$4 sm:$0xff]  }
 0x54b   :  { %1181 = vmatmul.mubr.bf16.vlgmr.msra.gmra.mxu0 %v1147_v52  ;;  %1222 = vmatmul.mubr.bf16.vlgmr.msra.gmra.mxu1 %v1147_v52  ;;  %v1140_v3 = vsel %vm603_vm1, %v1139_v1, 0.0 }
 0x54c   :  { %1141 = vadd.xlane.f32.xlu1 %v1140_v3  ;;  %1286 = vmatpush1.bf16.msra.mxu0 %v2697_v57 }
 0x54d   :  { %1327 = vmatpush1.bf16.msra.mxu1 %v2700_v59  ;;  %1287 = vmatprep.subr.bf16.mxu0 %v2703_v37 }
 0x54e   :  { %1328 = vmatprep.subr.bf16.mxu1 %v2767_v4  ;;  %1317 = vmatprep.mubr.bf16.mxu0 %v2325_v2 }
 0x54f   :  { %1358 = vmatprep.mubr.bf16.mxu1 %v2325_v2 }
 0x550   :  { %1288 = vmatpush1.bf16.msra.mxu0 %v2709_v60 }
 0x551   :  { %1329 = vmatpush1.bf16.msra.mxu1 %v2773_v40  ;;  %1289 = vmatprep.subr.bf16.mxu0 %v2713_v61 }
 0x552   :  { %1330 = vmatprep.subr.bf16.mxu1 %v2777_v5 }
 0x554   :  { %1290 = vmatpush1.bf16.msra.mxu0 %v2717_v62 }
 0x555   :  { %1331 = vmatpush1.bf16.msra.mxu1 %v2781_v7  ;;  %1291 = vmatprep.subr.bf16.mxu0 %v2721_v10 }
 0x556   :  { %1332 = vmatprep.subr.bf16.mxu1 %v2785_v8 }
 0x558   :  { %1292 = vmatpush1.bf16.msra.mxu0 %v2788_v54 }
 0x559   :  { %1333 = vmatpush1.bf16.msra.mxu1 %v2791_v46  ;;  %1293 = vmatprep.subr.bf16.mxu0 %v2794_v53 }
 0x55a   :  { %1334 = vmatprep.subr.bf16.mxu1 %v2797_v56 }
 0x55c   :  { %1294 = vmatpush1.bf16.msra.mxu0 %v2800_v11 }
 0x55d   :  { %1335 = vmatpush1.bf16.msra.mxu1 %v2803_v12  ;;  %1295 = vmatprep.subr.bf16.mxu0 %v2806_v15 }
 0x55e   :  { %1336 = vmatprep.subr.bf16.mxu1 %v2809_v16 }
 0x560   :  { %1296 = vmatpush1.bf16.msra.mxu0 %v2812_v19 }
 0x561   :  { %1337 = vmatpush1.bf16.msra.mxu1 %v2817_v20  ;;  %1297 = vmatprep.subr.bf16.mxu0 %v2820_v21 }
 0x562   :  { %1338 = vmatprep.subr.bf16.mxu1 %v2823_v24 }
 0x564   :  { %1298 = vmatpush1.bf16.msra.mxu0 %v2828_v25 }
 0x565   :  { %1339 = vmatpush1.bf16.msra.mxu1 %v2831_v26  ;;  %1299 = vmatprep.subr.bf16.mxu0 %v2834_v27 }
 0x566   :  { %1340 = vmatprep.subr.bf16.mxu1 %v2837_v29 }
 0x568   :  { %1300 = vmatpush1.bf16.msra.mxu0 %v2840_v30 }
 0x569   :  { %1341 = vmatpush1.bf16.msra.mxu1 %v2843_v32  ;;  %1422 = vmatprep.subr.bf16.mxu0 %v2747_v13 }
 0x56a   :  { %1463 = vmatprep.subr.bf16.mxu1 %v2750_v14  ;;  %v1145_v14 = vld [vmem:[#allocation2 + $0x30] sm:$0xc] }
 0x60b   :  { %v1182_v34 = vpop.f32.mrf.mxu0  ;;  %v1223_v35 = vpop.f32.mrf.mxu1 }
 0x60c   :  { %v1234_v36 = vrot.slane %v1182_v34, 6  ;;  %v1236_v13 = vrot.slane %v1223_v35, 6 }
 0x60d   :  { %v1184_v17 = vpop.f32.mrf.mxu0  ;;  %v1225_v0 = vpop.f32.mrf.mxu1 }
 0x60e   :  { %v1242_v6 = vadd.f32 %v1234_v36, %v1143_v33  ;;  %v1235_v28 = vrot.slane %v1184_v17, 6  ;;  %v1244_v47 = vadd.f32 %v1236_v13, %v1145_v14  ;;  %v1237_v51 = vrot.slane %v1225_v0, 6 }
 0x60f   :  { %v1186_v38 = vpop.f32.mrf.mxu0  ;;  %v1227_v39 = vpop.f32.mrf.mxu1  ;;  %v1266_v17 = vrot.slane %v2754_v48, 6 }
 0x610   :  { %v1924_v42 = vmul.f32 -1.442695, %v1242_v6  ;;  %v1243_v31 = vadd.f32 %v1235_v28, %v1144_v63  ;;  %v1926_v52 = vmul.f32 -1.442695, %v1244_v47  ;;  %v1245_v3 = vadd.f32 %v1237_v51, %v1146_v55 }
 0x611   :  { %v1187_v44 = vpop.f32.mrf.mxu0  ;;  %v1228_v45 = vpop.f32.mrf.mxu1 }
 0x612   :  { %2152 = vpow2.f32 %v1924_v42  ;;  %v1925_v43 = vmul.f32 -1.442695, %v1243_v31  ;;  %v2857_v44 = vld [vmem:[%s2938_s3] ss:$0 sm:$0xff]  ;;  %s1864_s3 = sld [smem:[#allocation3 + $0xc]] }
 0x614   :  { %2154 = vpow2.f32 %v1925_v43 }
 0x615   :  { %2156 = vpow2.f32 %v1926_v52 }
 0x618   :  { %s238_s14 = sshra.s32 %s1864_s3, 3  ;;  %s241_s15 = sand.u32 7, %s1864_s3 }
 0x619   :  { %s1954_s16 = sshll.u32 %s238_s14, 5 }
 0x61a   :  { %s244_s18 = sadd.s32 %s1954_s16, %s241_s15 }
 0x61b   :  { %s245_s1 = scalar_lea.vmem [#allocation6], %s244_s18 }
 0x61f   :  { %v2153_v1 = vpop.eup %2152 }
 0x620   :  { %v1255_v18 = vadd.f32 1.0, %v2153_v1 }
 0x621   :  { %v2155_v23 = vpop.eup %2154 }
 0x622   :  { %2158 = vrcp.f32 %v1255_v18  ;;  %v1256_v33 = vadd.f32 1.0, %v2155_v23  ;;  %v2157_v34 = vpop.eup %2156 }
 0x623   :  { %2160 = vtanh.f32 %v1245_v3  ;;  %v1257_v6 = vadd.f32 1.0, %v2157_v34 }
 0x624   :  { %2162 = vrcp.f32 %v1256_v33 }
 0x625   :  { %2164 = vrcp.f32 %v1257_v6  ;;  %v285_v6 = vld [vmem:[%s284_s8] ss:$8 sm:$0xf] }
 0x626   :  { %287 = vst.msk [vmem:[#allocation2 + $0x27] ss:$8 sm:$0xf] %vm2449_vm0, %v285_v6 }
 0x62f   :  { %v2159_v36 = vpop.eup %2158 }
 0x630   :  { %v2161_v63 = vpop.eup %2160 }
 0x631   :  { %v2163_v35 = vpop.eup %2162  ;;  %v1269_v0 = vmul.f32 %v2161_v63, %v2159_v36 }
 0x632   :  { %v1268_v28 = vmul.f32 %v2163_v35, %v1266_v17  ;;  %v2165_v39 = vpop.eup %2164  ;;  %v272_v35 = vld [vmem:[%s271_s7] ss:$8 sm:$0xf] }
 0x633   :  { %274 = vst.msk [vmem:[#allocation2 + $0x26] ss:$8 sm:$0xf] %vm2449_vm0, %v272_v35 }
 0x634   :  { %v2849_v38 = vadd.f32 %v1269_v0, %v1268_v28 }
 0x636   :  { %2166 = vtanh.f32 %v2849_v38  ;;  %v1403_v47 = vrot.slane %v2849_v38, 6 }
 0x63a   :  { %v1414_v28 = vld [vmem:[#allocation2 + $0x20] sm:$0xc0] }
 0x643   :  { %v2167_v42 = vpop.eup %2166 }
 0x644   :  { %v2852_v31 = vmul.f32 %v2167_v42, %v2165_v39  ;;  %v1415_v42 = vld [vmem:[#allocation2 + $0x28] sm:$0xc0] }
 0x646   :  { %v1273_v48 = vmul.f32 %v2857_v44, %v2852_v31  ;;  %v1281_v45 = vpack.c.bf16 %v2852_v31, %v2852_v31 }
 0x648   :  { %v1274_v43 = vsel %vm738_vm2, %v1273_v48, 0.0  ;;  %v1283_v13 = vrot.slane %v1281_v45, 1 }
 0x649   :  { %1275 = vadd.xlane.f32.xlu0 %v1274_v43 }
 0x64a   :  { %1318 = vmatmul.mubr.bf16.vlgmr.msra.gmra.mxu0 %v1283_v13  ;;  %1359 = vmatmul.mubr.bf16.vlgmr.msra.gmra.mxu1 %v1283_v13 }
 0x64b   :  { %1423 = vmatpush1.bf16.msra.mxu0 %v2697_v57  ;;  %1464 = vmatpush1.bf16.msra.mxu1 %v2700_v59  ;;  %v259_v57 = vld [vmem:[%s258_s21] ss:$8 sm:$0xf] }
 0x64c   :  { %1424 = vmatprep.subr.bf16.mxu0 %v2703_v37  ;;  %1465 = vmatprep.subr.bf16.mxu1 %v2767_v4  ;;  %261 = vst.msk [vmem:[#allocation2 + $0x25] ss:$8 sm:$0xf] %vm2449_vm0, %v259_v57 }
 0x64d   :  { %1454 = vmatprep.mubr.bf16.mxu0 %v2325_v2  ;;  %1495 = vmatprep.mubr.bf16.mxu1 %v2325_v2  ;;  %v246_v2 = vld [vmem:[%s245_s1] ss:$8 sm:$0xf] }
 0x64e   :  { %248 = vst.msk [vmem:[#allocation2 + $0x24] ss:$8 sm:$0xf] %vm2449_vm0, %v246_v2 }
 0x64f   :  { %1425 = vmatpush1.bf16.msra.mxu0 %v2709_v60  ;;  %1466 = vmatpush1.bf16.msra.mxu1 %v2773_v40 }
 0x650   :  { %1426 = vmatprep.subr.bf16.mxu0 %v2713_v61  ;;  %1467 = vmatprep.subr.bf16.mxu1 %v2777_v5 }
 0x653   :  { %1427 = vmatpush1.bf16.msra.mxu0 %v2717_v62  ;;  %1468 = vmatpush1.bf16.msra.mxu1 %v2781_v7 }
 0x654   :  { %1428 = vmatprep.subr.bf16.mxu0 %v2721_v10  ;;  %1469 = vmatprep.subr.bf16.mxu1 %v2785_v8 }
 0x655   :  { %v1277_v59 = vld [vmem:[#allocation2 + $0x20] sm:$0x30]  ;;  %v1278_v62 = vld [vmem:[#allocation2 + $0x28] sm:$0x30] }
 0x657   :  { %1429 = vmatpush1.bf16.msra.mxu0 %v2788_v54  ;;  %1470 = vmatpush1.bf16.msra.mxu1 %v2791_v46 }
 0x658   :  { %1430 = vmatprep.subr.bf16.mxu0 %v2794_v53  ;;  %1471 = vmatprep.subr.bf16.mxu1 %v2797_v56 }
 0x65b   :  { %1431 = vmatpush1.bf16.msra.mxu0 %v2800_v11  ;;  %1472 = vmatpush1.bf16.msra.mxu1 %v2803_v12 }
 0x65c   :  { %1432 = vmatprep.subr.bf16.mxu0 %v2806_v15  ;;  %1473 = vmatprep.subr.bf16.mxu1 %v2809_v16  ;;  %v1279_v15 = vld [vmem:[#allocation2 + $0x30] sm:$0x30] }
 0x65f   :  { %1433 = vmatpush1.bf16.msra.mxu0 %v2812_v19  ;;  %1474 = vmatpush1.bf16.msra.mxu1 %v2817_v20  ;;  %v1280_v20 = vld [vmem:[#allocation2 + $0x38] sm:$0x30] }
 0x660   :  { %1434 = vmatprep.subr.bf16.mxu0 %v2820_v21  ;;  %1475 = vmatprep.subr.bf16.mxu1 %v2823_v24 }
 0x663   :  { %1435 = vmatpush1.bf16.msra.mxu0 %v2828_v25  ;;  %1476 = vmatpush1.bf16.msra.mxu1 %v2831_v26 }
 0x664   :  { %1436 = vmatprep.subr.bf16.mxu0 %v2834_v27  ;;  %1477 = vmatprep.subr.bf16.mxu1 %v2837_v29 }
 0x667   :  { %1437 = vmatpush1.bf16.msra.mxu0 %v2840_v30  ;;  %1478 = vmatpush1.bf16.msra.mxu1 %v2843_v32 }
 0x70a   :  { %v1319_v37 = vpop.f32.mrf.mxu0  ;;  %v1360_v60 = vpop.f32.mrf.mxu1 }
 0x70b   :  { %v1371_v61 = vrot.slane %v1319_v37, 4  ;;  %v1373_v12 = vrot.slane %v1360_v60, 4 }
 0x70c   :  { %v1321_v10 = vpop.f32.mrf.mxu0  ;;  %v1362_v4 = vpop.f32.mrf.mxu1 }
 0x70d   :  { %v1379_v40 = vadd.f32 %v1371_v61, %v1277_v59  ;;  %v1372_v5 = vrot.slane %v1321_v10, 4  ;;  %v1381_v16 = vadd.f32 %v1373_v12, %v1279_v15  ;;  %v1374_v19 = vrot.slane %v1362_v4, 4  ;;  %v1416_v10 = vld [vmem:[#allocation2 + $0x30] sm:$0xc0] }
 0x70e   :  { %v1323_v7 = vpop.f32.mrf.mxu0  ;;  %v1364_v8 = vpop.f32.mrf.mxu1 }
 0x70f   :  { %v1927_v54 = vmul.f32 -1.442695, %v1379_v40  ;;  %v1380_v46 = vadd.f32 %v1372_v5, %v1278_v62  ;;  %v1929_v21 = vmul.f32 -1.442695, %v1381_v16  ;;  %v1382_v25 = vadd.f32 %v1374_v19, %v1280_v20  ;;  %v1417_v5 = vld [vmem:[#allocation2 + $0x38] sm:$0xc0] }
 0x710   :  { %v1324_v53 = vpop.f32.mrf.mxu0  ;;  %v1365_v56 = vpop.f32.mrf.mxu1 }
 0x711   :  { %2168 = vpow2.f32 %v1927_v54  ;;  %v1928_v11 = vmul.f32 -1.442695, %v1380_v46 }
 0x713   :  { %2170 = vpow2.f32 %v1928_v11 }
 0x714   :  { %2172 = vpow2.f32 %v1929_v21 }
 0x71e   :  { %v2169_v24 = vpop.eup %2168 }
 0x71f   :  { %v1392_v26 = vadd.f32 1.0, %v2169_v24 }
 0x720   :  { %v2171_v27 = vpop.eup %2170 }
 0x721   :  { %2174 = vrcp.f32 %v1392_v26  ;;  %v1393_v29 = vadd.f32 1.0, %v2171_v27  ;;  %v2173_v30 = vpop.eup %2172 }
 0x722   :  { %2176 = vtanh.f32 %v1382_v25  ;;  %v1394_v55 = vadd.f32 1.0, %v2173_v30 }
 0x723   :  { %2178 = vrcp.f32 %v1393_v29 }
 0x724   :  { %2180 = vrcp.f32 %v1394_v55 }
 0x72e   :  { %v2175_v32 = vpop.eup %2174 }
 0x72f   :  { %v2177_v14 = vpop.eup %2176 }
 0x730   :  { %v2179_v51 = vpop.eup %2178  ;;  %v1406_v1 = vmul.f32 %v2177_v14, %v2175_v32  ;;  %v741_v14 = vpop.xlane.xlu0 %740 }
 0x731   :  { %v1405_v52 = vmul.f32 %v2179_v51, %v1403_v47  ;;  %v2181_v18 = vpop.eup %2180  ;;  %v606_v51 = vpop.xlane.xlu1 %605 }
 0x733   :  { %v2901_v3 = vadd.f32 %v1406_v1, %v1405_v52  ;;  %v1552_v1 = vrot.slane %v741_v14, 2  ;;  %v1624_v14 = vrot.slane %v2690_v9, 6 }
 0x734   :  { %v879_v47 = vpop.xlane.xlu0 %878 }
 0x735   :  { %2182 = vtanh.f32 %v2901_v3  ;;  %v1540_v16 = vrot.slane %v2901_v3, 6  ;;  %v1017_v52 = vpop.xlane.xlu1 %1016  ;;  %v1555_v3 = vrot.slane %v879_v47, 4 }
 0x738   :  { %v1276_v55 = vpop.xlane.xlu0 %1275 }
 0x742   :  { %v2183_v23 = vpop.eup %2182 }
 0x743   :  { %v2904_v33 = vmul.f32 %v2183_v23, %v2181_v18  ;;  %v1558_v18 = vrot.slane %v1017_v52, 6 }
 0x745   :  { %v1410_v34 = vmul.f32 %v2857_v44, %v2904_v33  ;;  %v1418_v36 = vpack.c.bf16 %v2904_v33, %v2904_v33 }
 0x747   :  { %v1411_v63 = vsel %vm876_vm3, %v1410_v34, 0.0  ;;  %v1420_v17 = vrot.slane %v1418_v36, 2  ;;  %v1142_v34 = vpop.xlane.xlu1 %1141  ;;  %v1570_v36 = vsel %vm1569_vm5, %v606_v51, %v1552_v1 }
 0x748   :  { %1412 = vadd.xlane.f32.xlu0 %v1411_v63  ;;  %v1561_v63 = vrot.slane %v1276_v55, 2 }
 0x749   :  { %1455 = vmatmul.mubr.bf16.vlgmr.msra.gmra.mxu0 %v1420_v17  ;;  %1496 = vmatmul.mubr.bf16.vlgmr.msra.gmra.mxu1 %v1420_v17 }
 0x7d1   :  { %v1413_v23 = vpop.xlane.xlu0 %1412 }
 0x7d2   :  { %v1564_v17 = vrot.slane %v1413_v23, 4 }
 0x809   :  { %v1456_v0 = vpop.f32.mrf.mxu0  ;;  %v1497_v38 = vpop.f32.mrf.mxu1 }
 0x80a   :  { %v1508_v39 = vrot.slane %v1456_v0, 2  ;;  %v1510_v22 = vrot.slane %v1497_v38, 2 }
 0x80b   :  { %v1458_v48 = vpop.f32.mrf.mxu0  ;;  %v1499_v45 = vpop.f32.mrf.mxu1 }
 0x80c   :  { %v1516_v43 = vadd.f32 %v1508_v39, %v1414_v28  ;;  %v1509_v13 = vrot.slane %v1458_v48, 2  ;;  %v1518_v4 = vadd.f32 %v1510_v22, %v1416_v10  ;;  %v1511_v40 = vrot.slane %v1499_v45, 2  ;;  %v2064_v22 = vld [vmem:[#allocation9 + $0x38] sm:$0xff]  }
 0x80d   :  { %v1460_v2 = vpop.f32.mrf.mxu0  ;;  %v1501_v57 = vpop.f32.mrf.mxu1  ;;  %v2328_v10 = vmov 2  }
 0x80e   :  { %v1930_v59 = vmul.f32 -1.442695, %v1516_v43  ;;  %v1517_v37 = vadd.f32 %v1509_v13, %v1415_v42  ;;  %v1932_v7 = vmul.f32 -1.442695, %v1518_v4  ;;  %v1519_v54 = vadd.f32 %v1511_v40, %v1417_v5  ;;  %v2065_v4 = vld [vmem:[#allocation9 + $0x30] sm:$0xff]   ;;  %v2066_v5 = vld [vmem:[#allocation9 + $0x28] sm:$0xff]  }
 0x80f   :  { %v1461_v60 = vpop.f32.mrf.mxu0  ;;  %v1502_v61 = vpop.f32.mrf.mxu1  ;;  %v2329_v40 = vmov 7  }
 0x810   :  { %2184 = vpow2.f32 %v1930_v59  ;;  %v1931_v62 = vmul.f32 -1.442695, %v1517_v37  ;;  %v2326_v59 = vmov 1  }
 0x811   :  { %2008 = vset.pattern.permute.xlu1 %v2326_v59 }
 0x812   :  { %2186 = vpow2.f32 %v1931_v62  ;;  %v2327_v62 = vmov 0.0  }
 0x813   :  { %2188 = vpow2.f32 %v1932_v7  ;;  %1967 = vmatprep.subr.bf16.mxu0 %v2327_v62  ;;  %v2330_v7 = vmov 3   ;;  %1983 = vmatprep.mubr.msk.bf16.mxu0 %vm2334_vm13, %v2327_v62 }
 0x814   :  { %1968 = vmatpush3.bf16.msra.mxu0 %v2064_v22 }
 0x815   :  { %1969 = vmatprep.subr.bf16.mxu0 %v2327_v62 }
 0x818   :  { %1970 = vmatpush3.bf16.msra.mxu0 %v2065_v4 }
 0x819   :  { %1971 = vmatprep.subr.bf16.mxu0 %v2327_v62 }
 0x81c   :  { %1972 = vmatpush3.bf16.msra.mxu0 %v2066_v5 }
 0x81d   :  { %v2185_v8 = vpop.eup %2184  ;;  %1973 = vmatprep.subr.bf16.mxu0 %v2327_v62 }
 0x81e   :  { %v1529_v46 = vadd.f32 1.0, %v2185_v8  ;;  %v2067_v8 = vld [vmem:[#allocation9 + $0x20] sm:$0xff]  }
 0x81f   :  { %v2187_v53 = vpop.eup %2186 }
 0x820   :  { %2190 = vrcp.f32 %v1529_v46  ;;  %v1530_v56 = vadd.f32 1.0, %v2187_v53  ;;  %v2189_v11 = vpop.eup %2188  ;;  %1974 = vmatpush3.bf16.msra.mxu0 %v2067_v8  ;;  %v2068_v46 = vld [vmem:[#allocation9 + $0x18] sm:$0xff]   ;;  %v2332_v53 = vmov 5  }
 0x821   :  { %2192 = vtanh.f32 %v1519_v54  ;;  %v1531_v20 = vadd.f32 1.0, %v2189_v11  ;;  %v2331_v54 = vmov 4   ;;  %1975 = vmatprep.subr.bf16.mxu0 %v2327_v62  ;;  %v2333_v11 = vmov 6  }
 0x822   :  { %2194 = vrcp.f32 %v1530_v56  ;;  %v2069_v56 = vld [vmem:[#allocation9 + $0x10] sm:$0xff]  }
 0x823   :  { %2196 = vrcp.f32 %v1531_v20 }
 0x824   :  { %1976 = vmatpush3.bf16.msra.mxu0 %v2068_v46 }
 0x825   :  { %1977 = vmatprep.subr.bf16.mxu0 %v2327_v62 }
 0x828   :  { %1978 = vmatpush3.bf16.msra.mxu0 %v2069_v56 }
 0x829   :  { %1979 = vmatprep.subr.bf16.mxu0 %v2327_v62 }
 0x82d   :  { %v2191_v12 = vpop.eup %2190 }
 0x82e   :  { %v2193_v15 = vpop.eup %2192 }
 0x82f   :  { %v2195_v19 = vpop.eup %2194  ;;  %v1543_v21 = vmul.f32 %v2193_v15, %v2191_v12  ;;  %v2070_v12 = vld [vmem:[#allocation9 + $0x8] sm:$0xff]   ;;  %v2071_v15 = vld [vmem:[#allocation9] sm:$0xff]  }
 0x830   :  { %v1542_v24 = vmul.f32 %v2195_v19, %v1540_v16  ;;  %v2197_v26 = vpop.eup %2196  ;;  %1980 = vmatpush3.bf16.msra.mxu0 %v2070_v12  ;;  %v1606_v16 = vrot.slane %v2592_v58, 2  ;;  %v1639_v58 = vrot.slane %v2852_v31, 2 }
 0x831   :  { %1981 = vmatprep.subr.bf16.mxu0 %v2327_v62 }
 0x832   :  { %v1544_v25 = vadd.f32 %v1543_v21, %v1542_v24 }
 0x834   :  { %2198 = vtanh.f32 %v1544_v25  ;;  %1982 = vmatpush3.bf16.msra.mxu0 %v2071_v15  ;;  %v1615_v25 = vrot.slane %v2641_v50, 4  ;;  %v1648_v50 = vrot.slane %v2904_v33, 4 }
 0x841   :  { %v2199_v27 = vpop.eup %2198 }
 0x842   :  { %v2916_v29 = vmul.f32 %v2199_v27, %v2197_v26 }
 0x844   :  { %v1547_v30 = vmul.f32 %v2857_v44, %v2916_v29  ;;  %v1572_v44 = vsel %vm1571_vm6, %v1570_v36, %v1555_v3 }
 0x845   :  { %v1574_v35 = vsel %vm1573_vm7, %v1572_v44, %v1558_v18  ;;  %v1657_v44 = vrot.slane %v2916_v29, 6 }
 0x846   :  { %v1548_v32 = vsel %vm1014_vm4, %v1547_v30, 0.0  ;;  %v1576_v6 = vsel %vm1575_vm8, %v1574_v35, %v1142_v34 }
 0x847   :  { %1549 = vadd.xlane.f32.xlu1 %v1548_v32  ;;  %v1578_v0 = vsel %vm1577_vm9, %v1576_v6, %v1561_v63 }
 0x848   :  { %v1580_v39 = vsel %vm1579_vm10, %v1578_v0, %v1564_v17 }
 0x8d0   :  { %v1550_v28 = vpop.xlane.xlu1 %1549 }
 0x8d1   :  { %v1567_v38 = vrot.slane %v1550_v28, 6 }
 0x8d3   :  { %v1582_v42 = vsel %vm1581_vm11, %v1580_v39, %v1567_v38 }
 0x8d4   :  { %v1584_v48 = vsel %vm1583_vm12, %v1582_v42, -inf }
 0x8d5   :  { %1585 = vmax.xlane.f32.xlu0 %v1584_v48 }
 0x95e   :  { %v1586_v45 = vpop.xlane.xlu0 %1585 }
 0x95f   :  { %v1587_v43 = vsub.f32 %v1582_v42, %v1586_v45 }
 0x961   :  { %v1588_v13 = vmul.f32 1.442695, %v1587_v43 }
 0x963   :  { %2200 = vpow2.f32 %v1588_v13 }
 0x970   :  { %v2201_v2 = vpop.eup %2200 }
 0x971   :  { %v1590_v57 = vsel %vm1583_vm12, %v2201_v2, 0.0 }
 0x972   :  { %1591 = vadd.xlane.f32.xlu1 %v1590_v57 }
 0x9fb   :  { %v1592_v37 = vpop.xlane.xlu1 %1591 }
 0x9fc   :  { %2202 = vrcp.f32 %v1592_v37 }
 0xa09   :  { %v2203_v60 = vpop.eup %2202 }
 0xa0a   :  { %v1594_v61 = vmul.f32 %v2203_v60, %v2201_v2 }
 0xa0c   :  { %1602 = vperm.xlu1 %2008, %v1594_v61   ;;  %1597 = vperm.xlu0 %2007, %v1594_v61  }
 0xa10   :  { %2009 = vset.pattern.permute.xlu1 %v2328_v10  ;;  %2015 = vset.pattern.permute.xlu0 %v2329_v40 }
 0xa11   :  { %1611 = vperm.xlu1 %2009, %v1594_v61  }
 0xa15   :  { %2010 = vset.pattern.permute.xlu1 %v2330_v7 }
 0xa16   :  { %1620 = vperm.xlu1 %2010, %v1594_v61  }
 0xa1a   :  { %2011 = vset.pattern.permute.xlu1 %v2331_v54 }
 0xa1b   :  { %1629 = vperm.xlu1 %2011, %v1594_v61  }
 0xa1f   :  { %2012 = vset.pattern.permute.xlu1 %v2332_v53 }
 0xa20   :  { %1635 = vperm.xlu1 %2012, %v1594_v61  }
 0xa24   :  { %2013 = vset.pattern.permute.xlu1 %v2333_v11 }
 0xa25   :  { %1644 = vperm.xlu1 %2013, %v1594_v61  }
 0xa29   :  { %2014 = vset.pattern.permute.xlu1 %v2329_v40 }
 0xa2a   :  { %1653 = vperm.xlu1 %2014, %v1594_v61  }
 0xa87   :  { %v1603_v19 = vpop.permute.xlu1 %1602  ;;  %v1598_v20 = vpop.permute.xlu0 %1597 }
 0xa88   :  { %v1608_v21 = vmul.f32 %v1606_v16, %v1603_v19  ;;  %v1600_v24 = vmul.f32 %v1598_v20, %v2543_v41 }
 0xa8a   :  { %v1609_v27 = vadd.f32 %v1608_v21, %v1600_v24 }
 0xa8c   :  { %v1612_v26 = vpop.permute.xlu1 %1611 }
 0xa8d   :  { %v1617_v30 = vmul.f32 %v1615_v25, %v1612_v26 }
 0xa8f   :  { %v1618_v32 = vadd.f32 %v1617_v30, %v1609_v27 }
 0xa91   :  { %v1621_v47 = vpop.permute.xlu1 %1620 }
 0xa92   :  { %v1626_v51 = vmul.f32 %v1624_v14, %v1621_v47 }
 0xa94   :  { %v1627_v55 = vadd.f32 %v1626_v51, %v1618_v32 }
 0xa96   :  { %v1630_v52 = vpop.permute.xlu1 %1629 }
 0xa97   :  { %v1632_v1 = vmul.f32 %v1630_v52, %v2757_v49  ;;  %v1933_v49 = vld [vmem:[%s2940_s5] ss:$0 sm:$0xff] }
 0xa99   :  { %v1633_v18 = vadd.f32 %v1632_v1, %v1627_v55 }
 0xa9b   :  { %v1636_v3 = vpop.permute.xlu1 %1635 }
 0xa9c   :  { %v1641_v23 = vmul.f32 %v1639_v58, %v1636_v3 }
 0xa9e   :  { %v1642_v41 = vadd.f32 %v1641_v23, %v1633_v18 }
 0xaa0   :  { %v1645_v34 = vpop.permute.xlu1 %1644 }
 0xaa1   :  { %v1650_v36 = vmul.f32 %v1648_v50, %v1645_v34 }
 0xaa3   :  { %v1651_v63 = vadd.f32 %v1650_v36, %v1642_v41 }
 0xaa5   :  { %v1654_v9 = vpop.permute.xlu1 %1653 }
 0xaa6   :  { %v1659_v17 = vmul.f32 %v1657_v44, %v1654_v9 }
 0xaa8   :  { %v1660_v35 = vadd.f32 %v1659_v17, %v1651_v63 }
 0xaaa   :  { %v1661_v6 = vpack.c.bf16 %v1660_v35, %v1660_v35 }
 0xaac   :  { %1984 = vmatmul.mubr.bf16.vlgmr.msra.gmra.mxu0 %v1661_v6 }
 0xb6c   :  { %v1767_v31 = vpop.f32.mrf.mxu0 }
 0xb6d   :  { %v1768_v28 = vadd.f32 %v1933_v49, %v1767_v31 }
 0xb6e   :  { %v1985_v0 = vpop.f32.mrf.mxu0 }
 0xb6f   :  { %1773 = vst [vmem:[%s2941_s6] sm:$0x3] %v1768_v28 }
 0xb70   :  { %v1770_v33 = vpop.f32.mrf.mxu0 }
 0xb72   :  { %v1986_v38 = vpop.f32.mrf.mxu0 }
 0xb73   :  { %1778 = vsyncpa [#allocation4], 1 }
 0xb74   :  { %1779 = vsyncpa [#allocation8], 1 }
 0xb75   :  { %1780 = vsyncpa [#allocation5], 1 }

</bundles_post_ra>
